<compile_context>
chip_gen: v6e
topology: v6e:2x2x1
jax: 0.10.0
libtpu: 0.0.40
codegen_flags: <defaults>
</compile_context>

<pallas_src>
import jax
import jax.numpy as jnp
from jax.experimental import pallas as pl
from jax.experimental.pallas import tpu as pltpu


def _round_up(x, m):
    return ((x + m - 1) // m) * m


def _vmem_capacity_bytes(default=64 * 1024 * 1024):
    """Per-core VMEM capacity; conservative (v7x-sized) fallback."""
    try:
        info = pltpu.get_tpu_info()
        cap = getattr(info, "vmem_capacity_bytes", None)
        if cap:
            return int(cap)
    except Exception:
        pass
    return default


def _make_biaffine_kernel(o_tile, compute_dtype, t21_hoist_axis):
    """Kernel closure.

    Ref shapes:
      x2_ref : (1, tL2, D2)             input2 tile
      x1t_ref: (1, D1pad, L1pad)        input1^T, ones row at D1 (if bias0), zero padded
      wm_ref : (1, o_tile, D2, D1pad)   per-o main W blocks (bias-0 column folded in)
      wb1_ref: (1, o_tile, D1pad)       per-o bias-1 rows (+ corner at lane D1)
      out_ref: (1, o_tile, tL2, L1pad)  scores out[0, oo, j, i]
      t21_ref: (o_tile, L1pad) f32      persistent scratch: bias-1 (+corner) term
    """

    def kernel(x2_ref, x1t_ref, wm_ref, wb1_ref, out_ref, t21_ref):
        def compute_t21():
            t21_ref[...] = jnp.dot(wb1_ref[0], x1t_ref[0],
                                   preferred_element_type=jnp.float32)

        if t21_hoist_axis is None:
            compute_t21()                      # weight tile changes every step
        else:
            # Recompute only when the hoist axis resets (start of each (o-tile, b)).
            pl.when(pl.program_id(t21_hoist_axis) == 0)(compute_t21)

        x2 = x2_ref[0]                         # (tL2, D2)
        for oo in range(o_tile):               # small static unroll
            # Stage A: (tL2, D2) @ (D2, D1pad); lane D1 carries the bias-0 term.
            tmp = jnp.dot(x2, wm_ref[0, oo], preferred_element_type=jnp.float32)
            # Stage B: (tL2, D1pad) @ (D1pad, L1pad); the ones row of x1t folds the
            # bias-0 term back in, broadcast over i.
            score = jnp.dot(tmp.astype(compute_dtype), x1t_ref[0],
                            preferred_element_type=jnp.float32)
            score = score + t21_ref[oo:oo + 1, :]
            out_ref[0, oo] = score.astype(out_ref.dtype)

    return kernel


def biaffine_forward(input1, input2, weight, out_features, bias=(True, True),
                     *, compute_dtype=None, l2_tile=None, o_tile=None,
                     grid_order=None, single_buffer_weights=True,
                     transpose_output=True):
    """Pallas implementation of Biaffine.forward.

    input1: (B, L1, in1)
    input2: (B, L2, in2)
    weight: (out_features * (in2 + bias[1]), in1 + bias[0])   -- nn.Linear weight
    returns (B, L2, L1, out_features)   (or the kernel-native (B, O, L2, L1)
    layout when transpose_output=False).
    """
    B, L1, D1 = input1.shape
    B2, L2, D2 = input2.shape
    assert B == B2
    O = out_features
    D1p = D1 + int(bias[0])
    D2p = D2 + int(bias[1])
    assert weight.shape == (O * D2p, D1p), (weight.shape, (O * D2p, D1p))

    out_dtype = input1.dtype
    # bf16 MXU compute by default (f32 accumulation).
    compute_dtype = jnp.dtype(jnp.bfloat16 if compute_dtype is None else compute_dtype)
    cs = compute_dtype.itemsize
    osz = jnp.dtype(out_dtype).itemsize
    out_sub = max(8, 32 // osz)          # sublane multiple for unpacked output stores

    # ---- padded feature / length dims (128-lane alignment) ----------------------
    D1pad = _round_up(D1 + int(bias[0]), 128)   # reserve a lane for the bias-0 column
    L1pad = _round_up(L1, 128)

    # ---- tile planning (generation-aware VMEM budget) ----------------------------
    vmem_cap = _vmem_capacity_bytes()
    budget = int(vmem_cap * 0.7)

    if l2_tile is None:
        l2_tile = 256
    l2_tile = min(int(l2_tile), _round_up(L2, out_sub))
    l2_tile = max(out_sub, (l2_tile // out_sub) * out_sub)

    def vmem_need(ot, lt):
        act = 2 * lt * D2 * cs + 2 * D1pad * L1pad * cs      # x2 + x1t (double-buffered)
        wgt = 2 * ot * (D2 + 1) * D1pad * cs                 # wm + wb1 (double-buffered)
        outb = 2 * ot * lt * L1pad * osz                     # output tile (double-buffered)
        scr = ot * L1pad * 4                                 # t21 scratch
        work = 2 * lt * (D1pad + L1pad) * 4                  # per-oo tmp / score staging
        return act + wgt + outb + scr + work + (1 << 20)

    if o_tile is None:
        while True:
            best = None
            for t in range(1, min(O, 16) + 1):               # cap unroll at 16
                if O % t == 0 and vmem_need(t, l2_tile) <= budget:
                    best = t
            if best is not None or l2_tile <= out_sub:
                o_tile = best if best is not None else 1
                break
            l2_tile = max(out_sub, (l2_tile // 2 // out_sub) * out_sub)
    assert O % o_tile == 0, "o_tile must divide out_features"
    n_ot = O // o_tile

    n_jt = -(-L2 // l2_tile)          # cdiv
    L2pad = n_jt * l2_tile
    need_bytes = vmem_need(o_tile, l2_tile)
    vmem_limit = int(min(vmem_cap, max(need_bytes + (8 << 20), 32 << 20)))
    # TODO(synk): very large D1/D2 feature dims would additionally need K-dim tiling.

    # ---- static weight decomposition / layout (done once) ------------------------
    wr = weight.reshape(O, D2p, D1p)                          # W[o, d2p, d1p]
    wm = jnp.zeros((O, D2, D1pad), weight.dtype).at[:, :, :D1].set(wr[:, :D2, :D1])
    if bias[0]:
        wm = wm.at[:, :, D1].set(wr[:, :D2, D1])              # bias-0 column -> lane D1
    wb1 = jnp.zeros((O, D1pad), weight.dtype)
    if bias[1]:
        wb1 = wb1.at[:, :D1].set(wr[:, D2, :D1])              # bias-1 row
        if bias[0]:
            wb1 = wb1.at[:, D1].set(wr[:, D2, D1])            # corner -> lane D1
    wm = wm.reshape(n_ot, o_tile, D2, D1pad).astype(compute_dtype)
    wb1 = wb1.reshape(n_ot, o_tile, D1pad).astype(compute_dtype)

    # ---- activations: cast, transpose x1, append ones row, zero-pad --------------
    x2p = input2.astype(compute_dtype)
    if L2pad != L2:
        x2p = jnp.pad(x2p, ((0, 0), (0, L2pad - L2), (0, 0)))

    x1t = jnp.transpose(input1, (0, 2, 1))                    # (B, D1, L1)
    if bias[0]:
        x1t = jnp.concatenate([x1t, jnp.ones((B, 1, L1), x1t.dtype)], axis=1)
    d1a = D1 + int(bias[0])
    x1t = jnp.pad(x1t, ((0, 0), (0, D1pad - d1a), (0, L1pad - L1)))
    x1t = x1t.astype(compute_dtype)                           # (B, D1pad, L1pad)

    # ---- grid order: weights-resident vs activations-resident --------------------
    if grid_order is None:
        if n_ot == 1:
            grid_order = "weights_inner"      # batch leads -> megacore-friendly on v7x
        else:
            x2_b, x1_b = x2p.size * cs, x1t.size * cs
            w_b = (wm.size + wb1.size) * cs
            cost_resident = n_ot * (x2_b + x1_b) + w_b
            cost_inner = x2_b + x1_b + B * n_jt * w_b
            grid_order = ("weights_resident" if cost_resident <= cost_inner
                          else "weights_inner")
    assert grid_order in ("weights_resident", "weights_inner")

    if grid_order == "weights_resident":
        grid = (n_ot, B, n_jt)
        x2_map = lambda ot, b, jt: (b, jt, 0)
        x1_map = lambda ot, b, jt: (b, 0, 0)
        wm_map = lambda ot, b, jt: (ot, 0, 0, 0)
        wb_map = lambda ot, b, jt: (ot, 0, 0)
        out_map = lambda ot, b, jt: (b, ot, jt, 0)
        t21_hoist_axis = 2                 # t21 fresh at the start of each (ot, b)
        semantics = ("parallel", "parallel", "arbitrary")
        weights_resident = True
    else:
        grid = (B, n_jt, n_ot)
        x2_map = lambda b, jt, ot: (b, jt, 0)
        x1_map = lambda b, jt, ot: (b, 0, 0)
        wm_map = lambda b, jt, ot: (ot, 0, 0, 0)
        wb_map = lambda b, jt, ot: (ot, 0, 0)
        out_map = lambda b, jt, ot: (b, ot, jt, 0)
        if n_ot == 1:
            t21_hoist_axis = 1
            semantics = ("parallel", "arbitrary", "arbitrary")
        else:
            t21_hoist_axis = None          # weights change every step; recompute (tiny)
            semantics = ("parallel", "parallel", "parallel")
        weights_resident = (n_ot == 1)

    kernel = _make_biaffine_kernel(o_tile, compute_dtype, t21_hoist_axis)

    flops = 2 * B * O * L2pad * D1pad * (D2 + L1pad)
    bytes_accessed = ((x2p.size + x1t.size + wm.size + wb1.size) * cs
                      + B * O * L2pad * L1pad * osz)
    cost = pl.CostEstimate(flops=flops, transcendentals=0,
                           bytes_accessed=bytes_accessed)

    def call(single_buffer):
        buffered = getattr(pl, "Buffered", None)

        def wspec(shape, imap):
            if single_buffer and buffered is not None:
                return pl.BlockSpec(shape, imap, pipeline_mode=buffered(1))
            return pl.BlockSpec(shape, imap)

        return pl.pallas_call(
            kernel,
            out_shape=jax.ShapeDtypeStruct((B, O, L2pad, L1pad), out_dtype),
            grid_spec=pltpu.PrefetchScalarGridSpec(
                num_scalar_prefetch=0,
                grid=grid,
                in_specs=[
                    pl.BlockSpec((1, l2_tile, D2), x2_map),
                    pl.BlockSpec((1, D1pad, L1pad), x1_map),
                    wspec((1, o_tile, D2, D1pad), wm_map),
                    wspec((1, o_tile, D1pad), wb_map),
                ],
                out_specs=pl.BlockSpec((1, o_tile, l2_tile, L1pad), out_map),
                scratch_shapes=[pltpu.VMEM((o_tile, L1pad), jnp.float32)],
            ),
            compiler_params=pltpu.CompilerParams(
                dimension_semantics=semantics,
                vmem_limit_bytes=vmem_limit),
            cost_estimate=cost,
        )(x2p, x1t, wm, wb1)

    use_single = bool(single_buffer_weights and weights_resident)
    if use_single:
        try:
            out = call(True)
        except Exception:
            out = call(False)   # pipeline_mode/Buffered(1) unsupported -> default buffering
    else:
        out = call(False)

    out = out[:, :, :L2, :L1]
    if transpose_output:
        # TODO(synk): this transpose is an extra HBM pass over the largest array;
        # consumers that accept the native (B, O, L2, L1) layout should pass
        # transpose_output=False.
        out = jnp.transpose(out, (0, 2, 3, 1))
    return out


def _biaffine_reference(input1, input2, weight, out_features, bias=(True, True)):
    """Pure-JAX replica of the PyTorch forward (highest matmul precision)."""
    B, L1, _ = input1.shape
    _, L2, _ = input2.shape
    if bias[0]:
        input1 = jnp.concatenate([input1, jnp.ones((B, L1, 1), input1.dtype)], axis=2)
    if bias[1]:
        input2 = jnp.concatenate([input2, jnp.ones((B, L2, 1), input2.dtype)], axis=2)
    hi = jax.lax.Precision.HIGHEST
    affine = jnp.einsum('bld,od->blo', input1, weight, precision=hi)   # Linear, no bias
    affine = affine.reshape(B, L1 * out_features, input2.shape[-1])
    biaffine = jnp.einsum('bmk,bjk->bmj', affine, input2, precision=hi)
    biaffine = jnp.transpose(biaffine, (0, 2, 1))
    return biaffine.reshape(B, L2, L1, out_features)


def _run_case(key, B, L1, L2, in1, in2, O, bias, *, compute_dtype=jnp.float32,
              l2_tile=None, o_tile=None, grid_order=None, atol=1e-3, rtol=1e-3):
    k1, k2, kw = jax.random.split(key, 3)
    x1 = jax.random.normal(k1, (B, L1, in1), dtype=jnp.float32)
    x2 = jax.random.normal(k2, (B, L2, in2), dtype=jnp.float32)
    lin_out = O * (in2 + int(bias[1]))
    lin_in = in1 + int(bias[0])
    w = 0.05 * jax.random.normal(kw, (lin_out, lin_in), dtype=jnp.float32)

    out = biaffine_forward(x1, x2, w, O, bias, compute_dtype=compute_dtype,
                           l2_tile=l2_tile, o_tile=o_tile, grid_order=grid_order)
    out = jax.block_until_ready(out)
    assert out.shape == (B, L2, L1, O), out.shape

    ref = _biaffine_reference(x1, x2, w, O, bias)
    err = float(jnp.max(jnp.abs(out - ref)))
    assert jnp.allclose(out, ref, atol=atol, rtol=rtol), (bias, str(compute_dtype), err)
    return err


if __name__ == "__main__":
    key = jax.random.PRNGKey(0)
    keys = jax.random.split(key, 8)

    # All bias configurations (exercises the folded bias decomposition), f32 compute.
    _run_case(keys[0], 2, 16, 16, 32, 32, 4, (True, True))
    _run_case(keys[1], 2, 16, 16, 32, 32, 4, (True, False))
    _run_case(keys[2], 2, 16, 16, 32, 32, 4, (False, True))
    _run_case(keys[3], 2, 16, 16, 32, 32, 4, (False, False))

    # Multi-step grids: explicit O / L2 tiling, both grid orders.
    _run_case(keys[4], 2, 16, 16, 32, 32, 4, (True, True), l2_tile=8, o_tile=2,
              grid_order="weights_resident")
    _run_case(keys[5], 2, 16, 16, 32, 32, 4, (True, True), l2_tile=8, o_tile=2,
              grid_order="weights_inner")

    # Ragged sizes: L2 padding, odd feature dims, O not a power of two.
    _run_case(keys[6], 2, 8, 12, 24, 40, 3, (True, True), l2_tile=8)

    # Default compute dtype (bfloat16 MXU path) -> looser tolerance.
    _run_case(keys[7], 2, 16, 16, 32, 32, 4, (True, True),
              compute_dtype=None, atol=8e-2, rtol=8e-2)

    print("KERNEL_OK")
</pallas_src>

<mosaic_0001>
module attributes {stable_mosaic.version = 11 : i64} {
  func.func @kernel(%arg0: i32, %arg1: i32, %arg2: i32, %arg3: memref<1x16x32xf32, #tpu.memory_space<vmem>>, %arg4: memref<1x128x128xf32, #tpu.memory_space<vmem>>, %arg5: memref<1x4x32x128xf32, #tpu.memory_space<vmem>>, %arg6: memref<1x4x128xf32, #tpu.memory_space<vmem>>, %arg7: memref<1x4x16x128xf32, #tpu.memory_space<vmem>>, %arg8: memref<4x128xf32, #tpu.memory_space<vmem>>) attributes {dimension_semantics = [#tpu.dimension_semantics<parallel>, #tpu.dimension_semantics<arbitrary>, #tpu.dimension_semantics<arbitrary>], iteration_bounds = array<i64: 2, 1, 1>, scalar_prefetch = 0 : i64, scratch_operands = 1 : i64, tpu.core_type = #tpu.core_type<tc>, window_params = [{transform_indices = @transform_0, window_bounds = array<i64: 1, 16, 32>}, {transform_indices = @transform_1, window_bounds = array<i64: 1, 128, 128>}, {pipeline_mode = #tpu.pipeline_mode<synchronous>, transform_indices = @transform_2, window_bounds = array<i64: 1, 4, 32, 128>}, {pipeline_mode = #tpu.pipeline_mode<synchronous>, transform_indices = @transform_3, window_bounds = array<i64: 1, 4, 128>}, {transform_indices = @transform_4, window_bounds = array<i64: 1, 4, 16, 128>}]} {
    %c0_i32 = arith.constant 0 : i32
    %0 = arith.cmpi eq, %arg1, %c0_i32 : i32
    %1 = arith.extui %0 : i1 to i32
    %c0_i32_0 = arith.constant 0 : i32
    %2 = arith.cmpi ne, %1, %c0_i32_0 : i32
    scf.if %2 {
      %c0_59 = arith.constant 0 : index
      %c0_60 = arith.constant 0 : index
      %c0_61 = arith.constant 0 : index
      %53 = vector.load %arg6[%c0_59, %c0_60, %c0_61] : memref<1x4x128xf32, #tpu.memory_space<vmem>>, vector<1x4x128xf32>
      %54 = vector.shape_cast %53 : vector<1x4x128xf32> to vector<4x128xf32>
      %c0_62 = arith.constant 0 : index
      %c0_63 = arith.constant 0 : index
      %c0_64 = arith.constant 0 : index
      %55 = vector.load %arg4[%c0_62, %c0_63, %c0_64] : memref<1x128x128xf32, #tpu.memory_space<vmem>>, vector<1x128x128xf32>
      %56 = vector.shape_cast %55 : vector<1x128x128xf32> to vector<128x128xf32>
      %cst_65 = arith.constant dense<0.000000e+00> : vector<4x128xf32>
      %57 = tpu.matmul %54, %56, %cst_65 {dimension_numbers = #tpu.dot_dimension_numbers<[1], [0], [0], [1], [0, 0, 1, 1], [], []>} : vector<4x128xf32>, vector<128x128xf32>, vector<4x128xf32> -> vector<4x128xf32>
      %c0_66 = arith.constant 0 : index
      %c0_67 = arith.constant 0 : index
      %58 = vector.load %arg8[%c0_66, %c0_67] : memref<4x128xf32, #tpu.memory_space<vmem>>, vector<4x128xf32>
      tpu.vector_store %arg8[%c0_66, %c0_67], %57 {strides = array<i32>} : memref<4x128xf32, #tpu.memory_space<vmem>>, vector<4x128xf32>,
    } else {
    }
    %c0 = arith.constant 0 : index
    %c0_1 = arith.constant 0 : index
    %c0_2 = arith.constant 0 : index
    %3 = vector.load %arg3[%c0, %c0_1, %c0_2] : memref<1x16x32xf32, #tpu.memory_space<vmem>>, vector<1x16x32xf32>
    %4 = vector.shape_cast %3 : vector<1x16x32xf32> to vector<16x32xf32>
    %c0_3 = arith.constant 0 : index
    %c0_4 = arith.constant 0 : index
    %c0_5 = arith.constant 0 : index
    %c0_6 = arith.constant 0 : index
    %5 = vector.load %arg5[%c0_3, %c0_4, %c0_5, %c0_6] : memref<1x4x32x128xf32, #tpu.memory_space<vmem>>, vector<1x1x32x128xf32>
    %6 = vector.shape_cast %5 : vector<1x1x32x128xf32> to vector<32x128xf32>
    %cst = arith.constant dense<0.000000e+00> : vector<16x128xf32>
    %7 = tpu.matmul %4, %6, %cst {dimension_numbers = #tpu.dot_dimension_numbers<[1], [0], [0], [1], [0, 0, 1, 1], [], []>} : vector<16x32xf32>, vector<32x128xf32>, vector<16x128xf32> -> vector<16x128xf32>
    %c0_7 = arith.constant 0 : index
    %c0_8 = arith.constant 0 : index
    %c0_9 = arith.constant 0 : index
    %8 = vector.load %arg4[%c0_7, %c0_8, %c0_9] : memref<1x128x128xf32, #tpu.memory_space<vmem>>, vector<1x128x128xf32>
    %9 = vector.shape_cast %8 : vector<1x128x128xf32> to vector<128x128xf32>
    %cst_10 = arith.constant dense<0.000000e+00> : vector<16x128xf32>
    %10 = tpu.matmul %7, %9, %cst_10 {dimension_numbers = #tpu.dot_dimension_numbers<[1], [0], [0], [1], [0, 0, 1, 1], [], []>} : vector<16x128xf32>, vector<128x128xf32>, vector<16x128xf32> -> vector<16x128xf32>
    %c0_11 = arith.constant 0 : index
    %c0_12 = arith.constant 0 : index
    %11 = vector.load %arg8[%c0_11, %c0_12] : memref<4x128xf32, #tpu.memory_space<vmem>>, vector<1x128xf32>
    %12 = vector.broadcast %11 : vector<1x128xf32> to vector<16x128xf32>
    %13 = arith.addf %10, %12 : vector<16x128xf32>
    %c0_13 = arith.constant 0 : index
    %c0_14 = arith.constant 0 : index
    %c0_15 = arith.constant 0 : index
    %c0_16 = arith.constant 0 : index
    %14 = vector.load %arg7[%c0_13, %c0_14, %c0_15, %c0_16] : memref<1x4x16x128xf32, #tpu.memory_space<vmem>>, vector<1x1x16x128xf32>
    %15 = vector.shape_cast %14 : vector<1x1x16x128xf32> to vector<16x128xf32>
    %16 = vector.shape_cast %13 : vector<16x128xf32> to vector<1x1x16x128xf32>
    tpu.vector_store %arg7[%c0_13, %c0_14, %c0_15, %c0_16], %16 {strides = array<i32>} : memref<1x4x16x128xf32, #tpu.memory_space<vmem>>, vector<1x1x16x128xf32>,
    %c0_17 = arith.constant 0 : index
    %c1 = arith.constant 1 : index
    %c0_18 = arith.constant 0 : index
    %c0_19 = arith.constant 0 : index
    %17 = vector.load %arg5[%c0_17, %c1, %c0_18, %c0_19] : memref<1x4x32x128xf32, #tpu.memory_space<vmem>>, vector<1x1x32x128xf32>
    %18 = vector.shape_cast %17 : vector<1x1x32x128xf32> to vector<32x128xf32>
    %cst_20 = arith.constant dense<0.000000e+00> : vector<16x128xf32>
    %19 = tpu.matmul %4, %18, %cst_20 {dimension_numbers = #tpu.dot_dimension_numbers<[1], [0], [0], [1], [0, 0, 1, 1], [], []>} : vector<16x32xf32>, vector<32x128xf32>, vector<16x128xf32> -> vector<16x128xf32>
    %c0_21 = arith.constant 0 : index
    %c0_22 = arith.constant 0 : index
    %c0_23 = arith.constant 0 : index
    %20 = vector.load %arg4[%c0_21, %c0_22, %c0_23] : memref<1x128x128xf32, #tpu.memory_space<vmem>>, vector<1x128x128xf32>
    %21 = vector.shape_cast %20 : vector<1x128x128xf32> to vector<128x128xf32>
    %cst_24 = arith.constant dense<0.000000e+00> : vector<16x128xf32>
    %22 = tpu.matmul %19, %21, %cst_24 {dimension_numbers = #tpu.dot_dimension_numbers<[1], [0], [0], [1], [0, 0, 1, 1], [], []>} : vector<16x128xf32>, vector<128x128xf32>, vector<16x128xf32> -> vector<16x128xf32>
    %c1_25 = arith.constant 1 : index
    %c0_26 = arith.constant 0 : index
    %23 = vector.load %arg8[%c1_25, %c0_26] : memref<4x128xf32, #tpu.memory_space<vmem>>, vector<1x128xf32>
    %24 = vector.broadcast %23 : vector<1x128xf32> to vector<16x128xf32>
    %25 = arith.addf %22, %24 : vector<16x128xf32>
    %c0_27 = arith.constant 0 : index
    %c1_28 = arith.constant 1 : index
    %c0_29 = arith.constant 0 : index
    %c0_30 = arith.constant 0 : index
    %26 = vector.load %arg7[%c0_27, %c1_28, %c0_29, %c0_30] : memref<1x4x16x128xf32, #tpu.memory_space<vmem>>, vector<1x1x16x128xf32>
    %27 = vector.shape_cast %26 : vector<1x1x16x128xf32> to vector<16x128xf32>
    %28 = vector.shape_cast %25 : vector<16x128xf32> to vector<1x1x16x128xf32>
    tpu.vector_store %arg7[%c0_27, %c1_28, %c0_29, %c0_30], %28 {strides = array<i32>} : memref<1x4x16x128xf32, #tpu.memory_space<vmem>>, vector<1x1x16x128xf32>,
    %c0_31 = arith.constant 0 : index
    %c2 = arith.constant 2 : index
    %c0_32 = arith.constant 0 : index
    %c0_33 = arith.constant 0 : index
    %29 = vector.load %arg5[%c0_31, %c2, %c0_32, %c0_33] : memref<1x4x32x128xf32, #tpu.memory_space<vmem>>, vector<1x1x32x128xf32>
    %30 = vector.shape_cast %29 : vector<1x1x32x128xf32> to vector<32x128xf32>
    %cst_34 = arith.constant dense<0.000000e+00> : vector<16x128xf32>
    %31 = tpu.matmul %4, %30, %cst_34 {dimension_numbers = #tpu.dot_dimension_numbers<[1], [0], [0], [1], [0, 0, 1, 1], [], []>} : vector<16x32xf32>, vector<32x128xf32>, vector<16x128xf32> -> vector<16x128xf32>
    %c0_35 = arith.constant 0 : index
    %c0_36 = arith.constant 0 : index
    %c0_37 = arith.constant 0 : index
    %32 = vector.load %arg4[%c0_35, %c0_36, %c0_37] : memref<1x128x128xf32, #tpu.memory_space<vmem>>, vector<1x128x128xf32>
    %33 = vector.shape_cast %32 : vector<1x128x128xf32> to vector<128x128xf32>
    %cst_38 = arith.constant dense<0.000000e+00> : vector<16x128xf32>
    %34 = tpu.matmul %31, %33, %cst_38 {dimension_numbers = #tpu.dot_dimension_numbers<[1], [0], [0], [1], [0, 0, 1, 1], [], []>} : vector<16x128xf32>, vector<128x128xf32>, vector<16x128xf32> -> vector<16x128xf32>
    %c2_39 = arith.constant 2 : index
    %c0_40 = arith.constant 0 : index
    %35 = vector.load %arg8[%c2_39, %c0_40] : memref<4x128xf32, #tpu.memory_space<vmem>>, vector<1x128xf32>
    %36 = vector.broadcast %35 : vector<1x128xf32> to vector<16x128xf32>
    %37 = arith.addf %34, %36 : vector<16x128xf32>
    %c0_41 = arith.constant 0 : index
    %c2_42 = arith.constant 2 : index
    %c0_43 = arith.constant 0 : index
    %c0_44 = arith.constant 0 : index
    %38 = vector.load %arg7[%c0_41, %c2_42, %c0_43, %c0_44] : memref<1x4x16x128xf32, #tpu.memory_space<vmem>>, vector<1x1x16x128xf32>
    %39 = vector.shape_cast %38 : vector<1x1x16x128xf32> to vector<16x128xf32>
    %40 = vector.shape_cast %37 : vector<16x128xf32> to vector<1x1x16x128xf32>
    tpu.vector_store %arg7[%c0_41, %c2_42, %c0_43, %c0_44], %40 {strides = array<i32>} : memref<1x4x16x128xf32, #tpu.memory_space<vmem>>, vector<1x1x16x128xf32>,
    %c0_45 = arith.constant 0 : index
    %c3 = arith.constant 3 : index
    %c0_46 = arith.constant 0 : index
    %c0_47 = arith.constant 0 : index
    %41 = vector.load %arg5[%c0_45, %c3, %c0_46, %c0_47] : memref<1x4x32x128xf32, #tpu.memory_space<vmem>>, vector<1x1x32x128xf32>
    %42 = vector.shape_cast %41 : vector<1x1x32x128xf32> to vector<32x128xf32>
    %cst_48 = arith.constant dense<0.000000e+00> : vector<16x128xf32>
    %43 = tpu.matmul %4, %42, %cst_48 {dimension_numbers = #tpu.dot_dimension_numbers<[1], [0], [0], [1], [0, 0, 1, 1], [], []>} : vector<16x32xf32>, vector<32x128xf32>, vector<16x128xf32> -> vector<16x128xf32>
    %c0_49 = arith.constant 0 : index
    %c0_50 = arith.constant 0 : index
    %c0_51 = arith.constant 0 : index
    %44 = vector.load %arg4[%c0_49, %c0_50, %c0_51] : memref<1x128x128xf32, #tpu.memory_space<vmem>>, vector<1x128x128xf32>
    %45 = vector.shape_cast %44 : vector<1x128x128xf32> to vector<128x128xf32>
    %cst_52 = arith.constant dense<0.000000e+00> : vector<16x128xf32>
    %46 = tpu.matmul %43, %45, %cst_52 {dimension_numbers = #tpu.dot_dimension_numbers<[1], [0], [0], [1], [0, 0, 1, 1], [], []>} : vector<16x128xf32>, vector<128x128xf32>, vector<16x128xf32> -> vector<16x128xf32>
    %c3_53 = arith.constant 3 : index
    %c0_54 = arith.constant 0 : index
    %47 = vector.load %arg8[%c3_53, %c0_54] : memref<4x128xf32, #tpu.memory_space<vmem>>, vector<1x128xf32>
    %48 = vector.broadcast %47 : vector<1x128xf32> to vector<16x128xf32>
    %49 = arith.addf %46, %48 : vector<16x128xf32>
    %c0_55 = arith.constant 0 : index
    %c3_56 = arith.constant 3 : index
    %c0_57 = arith.constant 0 : index
    %c0_58 = arith.constant 0 : index
    %50 = vector.load %arg7[%c0_55, %c3_56, %c0_57, %c0_58] : memref<1x4x16x128xf32, #tpu.memory_space<vmem>>, vector<1x1x16x128xf32>
    %51 = vector.shape_cast %50 : vector<1x1x16x128xf32> to vector<16x128xf32>
    %52 = vector.shape_cast %49 : vector<16x128xf32> to vector<1x1x16x128xf32>
    tpu.vector_store %arg7[%c0_55, %c3_56, %c0_57, %c0_58], %52 {strides = array<i32>} : memref<1x4x16x128xf32, #tpu.memory_space<vmem>>, vector<1x1x16x128xf32>,
    return
  }
  func.func @transform_0(%arg0: i32, %arg1: i32, %arg2: i32) -> (i32, i32, i32) {
    %c0_i32 = arith.constant 0 : i32
    %c0_i32_0 = arith.constant 0 : i32
    return %arg0, %arg1, %c0_i32 : i32, i32, i32
  }
  func.func @transform_1(%arg0: i32, %arg1: i32, %arg2: i32) -> (i32, i32, i32) {
    %c0_i32 = arith.constant 0 : i32
    %c0_i32_0 = arith.constant 0 : i32
    %c0_i32_1 = arith.constant 0 : i32
    return %arg0, %c0_i32, %c0_i32_0 : i32, i32, i32
  }
  func.func @transform_2(%arg0: i32, %arg1: i32, %arg2: i32) -> (i32, i32, i32, i32) {
    %c0_i32 = arith.constant 0 : i32
    %c0_i32_0 = arith.constant 0 : i32
    %c0_i32_1 = arith.constant 0 : i32
    %c0_i32_2 = arith.constant 0 : i32
    return %arg2, %c0_i32, %c0_i32_0, %c0_i32_1 : i32, i32, i32, i32
  }
  func.func @transform_3(%arg0: i32, %arg1: i32, %arg2: i32) -> (i32, i32, i32) {
    %c0_i32 = arith.constant 0 : i32
    %c0_i32_0 = arith.constant 0 : i32
    %c0_i32_1 = arith.constant 0 : i32
    return %arg2, %c0_i32, %c0_i32_0 : i32, i32, i32
  }
  func.func @transform_4(%arg0: i32, %arg1: i32, %arg2: i32) -> (i32, i32, i32, i32) {
    %c0_i32 = arith.constant 0 : i32
    %c0_i32_0 = arith.constant 0 : i32
    return %arg0, %arg2, %arg1, %c0_i32 : i32, i32, i32, i32
  }
}

module attributes {stable_mosaic.version = 11 : i64} {
  func.func @kernel(%arg0: i32, %arg1: i32, %arg2: i32, %arg3: memref<1x16x32xf32, #tpu.memory_space<vmem>>, %arg4: memref<1x128x128xf32, #tpu.memory_space<vmem>>, %arg5: memref<1x4x32x128xf32, #tpu.memory_space<vmem>>, %arg6: memref<1x4x128xf32, #tpu.memory_space<vmem>>, %arg7: memref<1x4x16x128xf32, #tpu.memory_space<vmem>>, %arg8: memref<4x128xf32, #tpu.memory_space<vmem>>) attributes {dimension_semantics = [#tpu.dimension_semantics<parallel>, #tpu.dimension_semantics<arbitrary>, #tpu.dimension_semantics<arbitrary>], iteration_bounds = array<i64: 2, 1, 1>, scalar_prefetch = 0 : i64, scratch_operands = 1 : i64, tpu.core_type = #tpu.core_type<tc>, window_params = [{transform_indices = @transform_0, window_bounds = array<i64: 1, 16, 32>}, {transform_indices = @transform_1, window_bounds = array<i64: 1, 128, 128>}, {transform_indices = @transform_2, window_bounds = array<i64: 1, 4, 32, 128>}, {transform_indices = @transform_3, window_bounds = array<i64: 1, 4, 128>}, {transform_indices = @transform_4, window_bounds = array<i64: 1, 4, 16, 128>}]} {
    %c0_i32 = arith.constant 0 : i32
    %0 = arith.cmpi eq, %arg1, %c0_i32 : i32
    %1 = arith.extui %0 : i1 to i32
    %c0_i32_0 = arith.constant 0 : i32
    %2 = arith.cmpi ne, %1, %c0_i32_0 : i32
    scf.if %2 {
      %c0_59 = arith.constant 0 : index
      %c0_60 = arith.constant 0 : index
      %c0_61 = arith.constant 0 : index
      %53 = vector.load %arg6[%c0_59, %c0_60, %c0_61] : memref<1x4x128xf32, #tpu.memory_space<vmem>>, vector<1x4x128xf32>
      %54 = vector.shape_cast %53 : vector<1x4x128xf32> to vector<4x128xf32>
      %c0_62 = arith.constant 0 : index
      %c0_63 = arith.constant 0 : index
      %c0_64 = arith.constant 0 : index
      %55 = vector.load %arg4[%c0_62, %c0_63, %c0_64] : memref<1x128x128xf32, #tpu.memory_space<vmem>>, vector<1x128x128xf32>
      %56 = vector.shape_cast %55 : vector<1x128x128xf32> to vector<128x128xf32>
      %cst_65 = arith.constant dense<0.000000e+00> : vector<4x128xf32>
      %57 = tpu.matmul %54, %56, %cst_65 {dimension_numbers = #tpu.dot_dimension_numbers<[1], [0], [0], [1], [0, 0, 1, 1], [], []>} : vector<4x128xf32>, vector<128x128xf32>, vector<4x128xf32> -> vector<4x128xf32>
      %c0_66 = arith.constant 0 : index
      %c0_67 = arith.constant 0 : index
      %58 = vector.load %arg8[%c0_66, %c0_67] : memref<4x128xf32, #tpu.memory_space<vmem>>, vector<4x128xf32>
      tpu.vector_store %arg8[%c0_66, %c0_67], %57 {strides = array<i32>} : memref<4x128xf32, #tpu.memory_space<vmem>>, vector<4x128xf32>,
    } else {
    }
    %c0 = arith.constant 0 : index
    %c0_1 = arith.constant 0 : index
    %c0_2 = arith.constant 0 : index
    %3 = vector.load %arg3[%c0, %c0_1, %c0_2] : memref<1x16x32xf32, #tpu.memory_space<vmem>>, vector<1x16x32xf32>
    %4 = vector.shape_cast %3 : vector<1x16x32xf32> to vector<16x32xf32>
    %c0_3 = arith.constant 0 : index
    %c0_4 = arith.constant 0 : index
    %c0_5 = arith.constant 0 : index
    %c0_6 = arith.constant 0 : index
    %5 = vector.load %arg5[%c0_3, %c0_4, %c0_5, %c0_6] : memref<1x4x32x128xf32, #tpu.memory_space<vmem>>, vector<1x1x32x128xf32>
    %6 = vector.shape_cast %5 : vector<1x1x32x128xf32> to vector<32x128xf32>
    %cst = arith.constant dense<0.000000e+00> : vector<16x128xf32>
    %7 = tpu.matmul %4, %6, %cst {dimension_numbers = #tpu.dot_dimension_numbers<[1], [0], [0], [1], [0, 0, 1, 1], [], []>} : vector<16x32xf32>, vector<32x128xf32>, vector<16x128xf32> -> vector<16x128xf32>
    %c0_7 = arith.constant 0 : index
    %c0_8 = arith.constant 0 : index
    %c0_9 = arith.constant 0 : index
    %8 = vector.load %arg4[%c0_7, %c0_8, %c0_9] : memref<1x128x128xf32, #tpu.memory_space<vmem>>, vector<1x128x128xf32>
    %9 = vector.shape_cast %8 : vector<1x128x128xf32> to vector<128x128xf32>
    %cst_10 = arith.constant dense<0.000000e+00> : vector<16x128xf32>
    %10 = tpu.matmul %7, %9, %cst_10 {dimension_numbers = #tpu.dot_dimension_numbers<[1], [0], [0], [1], [0, 0, 1, 1], [], []>} : vector<16x128xf32>, vector<128x128xf32>, vector<16x128xf32> -> vector<16x128xf32>
    %c0_11 = arith.constant 0 : index
    %c0_12 = arith.constant 0 : index
    %11 = vector.load %arg8[%c0_11, %c0_12] : memref<4x128xf32, #tpu.memory_space<vmem>>, vector<1x128xf32>
    %12 = vector.broadcast %11 : vector<1x128xf32> to vector<16x128xf32>
    %13 = arith.addf %10, %12 : vector<16x128xf32>
    %c0_13 = arith.constant 0 : index
    %c0_14 = arith.constant 0 : index
    %c0_15 = arith.constant 0 : index
    %c0_16 = arith.constant 0 : index
    %14 = vector.load %arg7[%c0_13, %c0_14, %c0_15, %c0_16] : memref<1x4x16x128xf32, #tpu.memory_space<vmem>>, vector<1x1x16x128xf32>
    %15 = vector.shape_cast %14 : vector<1x1x16x128xf32> to vector<16x128xf32>
    %16 = vector.shape_cast %13 : vector<16x128xf32> to vector<1x1x16x128xf32>
    tpu.vector_store %arg7[%c0_13, %c0_14, %c0_15, %c0_16], %16 {strides = array<i32>} : memref<1x4x16x128xf32, #tpu.memory_space<vmem>>, vector<1x1x16x128xf32>,
    %c0_17 = arith.constant 0 : index
    %c1 = arith.constant 1 : index
    %c0_18 = arith.constant 0 : index
    %c0_19 = arith.constant 0 : index
    %17 = vector.load %arg5[%c0_17, %c1, %c0_18, %c0_19] : memref<1x4x32x128xf32, #tpu.memory_space<vmem>>, vector<1x1x32x128xf32>
    %18 = vector.shape_cast %17 : vector<1x1x32x128xf32> to vector<32x128xf32>
    %cst_20 = arith.constant dense<0.000000e+00> : vector<16x128xf32>
    %19 = tpu.matmul %4, %18, %cst_20 {dimension_numbers = #tpu.dot_dimension_numbers<[1], [0], [0], [1], [0, 0, 1, 1], [], []>} : vector<16x32xf32>, vector<32x128xf32>, vector<16x128xf32> -> vector<16x128xf32>
    %c0_21 = arith.constant 0 : index
    %c0_22 = arith.constant 0 : index
    %c0_23 = arith.constant 0 : index
    %20 = vector.load %arg4[%c0_21, %c0_22, %c0_23] : memref<1x128x128xf32, #tpu.memory_space<vmem>>, vector<1x128x128xf32>
    %21 = vector.shape_cast %20 : vector<1x128x128xf32> to vector<128x128xf32>
    %cst_24 = arith.constant dense<0.000000e+00> : vector<16x128xf32>
    %22 = tpu.matmul %19, %21, %cst_24 {dimension_numbers = #tpu.dot_dimension_numbers<[1], [0], [0], [1], [0, 0, 1, 1], [], []>} : vector<16x128xf32>, vector<128x128xf32>, vector<16x128xf32> -> vector<16x128xf32>
    %c1_25 = arith.constant 1 : index
    %c0_26 = arith.constant 0 : index
    %23 = vector.load %arg8[%c1_25, %c0_26] : memref<4x128xf32, #tpu.memory_space<vmem>>, vector<1x128xf32>
    %24 = vector.broadcast %23 : vector<1x128xf32> to vector<16x128xf32>
    %25 = arith.addf %22, %24 : vector<16x128xf32>
    %c0_27 = arith.constant 0 : index
    %c1_28 = arith.constant 1 : index
    %c0_29 = arith.constant 0 : index
    %c0_30 = arith.constant 0 : index
    %26 = vector.load %arg7[%c0_27, %c1_28, %c0_29, %c0_30] : memref<1x4x16x128xf32, #tpu.memory_space<vmem>>, vector<1x1x16x128xf32>
    %27 = vector.shape_cast %26 : vector<1x1x16x128xf32> to vector<16x128xf32>
    %28 = vector.shape_cast %25 : vector<16x128xf32> to vector<1x1x16x128xf32>
    tpu.vector_store %arg7[%c0_27, %c1_28, %c0_29, %c0_30], %28 {strides = array<i32>} : memref<1x4x16x128xf32, #tpu.memory_space<vmem>>, vector<1x1x16x128xf32>,
    %c0_31 = arith.constant 0 : index
    %c2 = arith.constant 2 : index
    %c0_32 = arith.constant 0 : index
    %c0_33 = arith.constant 0 : index
    %29 = vector.load %arg5[%c0_31, %c2, %c0_32, %c0_33] : memref<1x4x32x128xf32, #tpu.memory_space<vmem>>, vector<1x1x32x128xf32>
    %30 = vector.shape_cast %29 : vector<1x1x32x128xf32> to vector<32x128xf32>
    %cst_34 = arith.constant dense<0.000000e+00> : vector<16x128xf32>
    %31 = tpu.matmul %4, %30, %cst_34 {dimension_numbers = #tpu.dot_dimension_numbers<[1], [0], [0], [1], [0, 0, 1, 1], [], []>} : vector<16x32xf32>, vector<32x128xf32>, vector<16x128xf32> -> vector<16x128xf32>
    %c0_35 = arith.constant 0 : index
    %c0_36 = arith.constant 0 : index
    %c0_37 = arith.constant 0 : index
    %32 = vector.load %arg4[%c0_35, %c0_36, %c0_37] : memref<1x128x128xf32, #tpu.memory_space<vmem>>, vector<1x128x128xf32>
    %33 = vector.shape_cast %32 : vector<1x128x128xf32> to vector<128x128xf32>
    %cst_38 = arith.constant dense<0.000000e+00> : vector<16x128xf32>
    %34 = tpu.matmul %31, %33, %cst_38 {dimension_numbers = #tpu.dot_dimension_numbers<[1], [0], [0], [1], [0, 0, 1, 1], [], []>} : vector<16x128xf32>, vector<128x128xf32>, vector<16x128xf32> -> vector<16x128xf32>
    %c2_39 = arith.constant 2 : index
    %c0_40 = arith.constant 0 : index
    %35 = vector.load %arg8[%c2_39, %c0_40] : memref<4x128xf32, #tpu.memory_space<vmem>>, vector<1x128xf32>
    %36 = vector.broadcast %35 : vector<1x128xf32> to vector<16x128xf32>
    %37 = arith.addf %34, %36 : vector<16x128xf32>
    %c0_41 = arith.constant 0 : index
    %c2_42 = arith.constant 2 : index
    %c0_43 = arith.constant 0 : index
    %c0_44 = arith.constant 0 : index
    %38 = vector.load %arg7[%c0_41, %c2_42, %c0_43, %c0_44] : memref<1x4x16x128xf32, #tpu.memory_space<vmem>>, vector<1x1x16x128xf32>
    %39 = vector.shape_cast %38 : vector<1x1x16x128xf32> to vector<16x128xf32>
    %40 = vector.shape_cast %37 : vector<16x128xf32> to vector<1x1x16x128xf32>
    tpu.vector_store %arg7[%c0_41, %c2_42, %c0_43, %c0_44], %40 {strides = array<i32>} : memref<1x4x16x128xf32, #tpu.memory_space<vmem>>, vector<1x1x16x128xf32>,
    %c0_45 = arith.constant 0 : index
    %c3 = arith.constant 3 : index
    %c0_46 = arith.constant 0 : index
    %c0_47 = arith.constant 0 : index
    %41 = vector.load %arg5[%c0_45, %c3, %c0_46, %c0_47] : memref<1x4x32x128xf32, #tpu.memory_space<vmem>>, vector<1x1x32x128xf32>
    %42 = vector.shape_cast %41 : vector<1x1x32x128xf32> to vector<32x128xf32>
    %cst_48 = arith.constant dense<0.000000e+00> : vector<16x128xf32>
    %43 = tpu.matmul %4, %42, %cst_48 {dimension_numbers = #tpu.dot_dimension_numbers<[1], [0], [0], [1], [0, 0, 1, 1], [], []>} : vector<16x32xf32>, vector<32x128xf32>, vector<16x128xf32> -> vector<16x128xf32>
    %c0_49 = arith.constant 0 : index
    %c0_50 = arith.constant 0 : index
    %c0_51 = arith.constant 0 : index
    %44 = vector.load %arg4[%c0_49, %c0_50, %c0_51] : memref<1x128x128xf32, #tpu.memory_space<vmem>>, vector<1x128x128xf32>
    %45 = vector.shape_cast %44 : vector<1x128x128xf32> to vector<128x128xf32>
    %cst_52 = arith.constant dense<0.000000e+00> : vector<16x128xf32>
    %46 = tpu.matmul %43, %45, %cst_52 {dimension_numbers = #tpu.dot_dimension_numbers<[1], [0], [0], [1], [0, 0, 1, 1], [], []>} : vector<16x128xf32>, vector<128x128xf32>, vector<16x128xf32> -> vector<16x128xf32>
    %c3_53 = arith.constant 3 : index
    %c0_54 = arith.constant 0 : index
    %47 = vector.load %arg8[%c3_53, %c0_54] : memref<4x128xf32, #tpu.memory_space<vmem>>, vector<1x128xf32>
    %48 = vector.broadcast %47 : vector<1x128xf32> to vector<16x128xf32>
    %49 = arith.addf %46, %48 : vector<16x128xf32>
    %c0_55 = arith.constant 0 : index
    %c3_56 = arith.constant 3 : index
    %c0_57 = arith.constant 0 : index
    %c0_58 = arith.constant 0 : index
    %50 = vector.load %arg7[%c0_55, %c3_56, %c0_57, %c0_58] : memref<1x4x16x128xf32, #tpu.memory_space<vmem>>, vector<1x1x16x128xf32>
    %51 = vector.shape_cast %50 : vector<1x1x16x128xf32> to vector<16x128xf32>
    %52 = vector.shape_cast %49 : vector<16x128xf32> to vector<1x1x16x128xf32>
    tpu.vector_store %arg7[%c0_55, %c3_56, %c0_57, %c0_58], %52 {strides = array<i32>} : memref<1x4x16x128xf32, #tpu.memory_space<vmem>>, vector<1x1x16x128xf32>,
    return
  }
  func.func @transform_0(%arg0: i32, %arg1: i32, %arg2: i32) -> (i32, i32, i32) {
    %c0_i32 = arith.constant 0 : i32
    %c0_i32_0 = arith.constant 0 : i32
    return %arg0, %arg1, %c0_i32 : i32, i32, i32
  }
  func.func @transform_1(%arg0: i32, %arg1: i32, %arg2: i32) -> (i32, i32, i32) {
    %c0_i32 = arith.constant 0 : i32
    %c0_i32_0 = arith.constant 0 : i32
    %c0_i32_1 = arith.constant 0 : i32
    return %arg0, %c0_i32, %c0_i32_0 : i32, i32, i32
  }
  func.func @transform_2(%arg0: i32, %arg1: i32, %arg2: i32) -> (i32, i32, i32, i32) {
    %c0_i32 = arith.constant 0 : i32
    %c0_i32_0 = arith.constant 0 : i32
    %c0_i32_1 = arith.constant 0 : i32
    %c0_i32_2 = arith.constant 0 : i32
    return %arg2, %c0_i32, %c0_i32_0, %c0_i32_1 : i32, i32, i32, i32
  }
  func.func @transform_3(%arg0: i32, %arg1: i32, %arg2: i32) -> (i32, i32, i32) {
    %c0_i32 = arith.constant 0 : i32
    %c0_i32_0 = arith.constant 0 : i32
    %c0_i32_1 = arith.constant 0 : i32
    return %arg2, %c0_i32, %c0_i32_0 : i32, i32, i32
  }
  func.func @transform_4(%arg0: i32, %arg1: i32, %arg2: i32) -> (i32, i32, i32, i32) {
    %c0_i32 = arith.constant 0 : i32
    %c0_i32_0 = arith.constant 0 : i32
    return %arg0, %arg2, %arg1, %c0_i32 : i32, i32, i32, i32
  }
}

</mosaic_0001>

<bundles_post_ra>
// kernel: tpu_custom_call.1
= control target key start
LH: loop header
LB: loop body
LE: loop exit
PB: predicated region body
PF: predicated region fallthrough
CT: control target
= control target key end

     0   :  { %s2426_s0 = inlined_call_operand.hbm [shape: f32[2,16,32], index: 0, kind: input, shape index: {}]   ;;  %s2427_s1 = inlined_call_operand.hbm [shape: f32[2,128,128], index: 1, kind: input, shape index: {}]   ;;  %s2428_s2 = inlined_call_operand.hbm [shape: f32[1,4,32,128], index: 2, kind: input, shape index: {}]   ;;  %s2429_s3 = inlined_call_operand.vmem [shape: f32[1,4,128], index: 3, kind: input, shape index: {}]   ;;  %s2430_s4 = inlined_call_operand.hbm [shape: f32[2,4,16,128], index: 4, kind: output, shape index: {}]  }
   0x1   :  { %2439 = sst [smem:[#allocation18_spill]] %s2426_s0 }
   0x2   :  { %2440 = sst [smem:[#allocation19_spill]] %s2428_s2 }
   0x3   :  { %9 = vsyncpa [#allocation4], 0 }
   0x4   :  { %11 = vsyncpa [#allocation4 + $0x1], 0 }
   0x5   :  { %12 = vsyncpa [#allocation7], 0 }
   0x6   :  { %14 = vsyncpa [#allocation7 + $0x1], 0 }
   0x7   :  { %15 = vsyncpa [#allocation5], 0 }
   0x8   :  { %17 = vsyncpa [#allocation5 + $0x1], 0  ;;  %s1966_s15 = smov 0   ;;  %s1968_s16 = smov 0  }
   0x9   :  { %s1970_s17 = smov 0   ;;  %s1972_s18 = smov 0  }
   0xa   :  { %s1974_s19 = smov 0   ;;  %s1976_s20 = smov 0  }
   0xb LB: > { %2441 = sst [smem:[#allocation14_spill]] %s1917_s17  ;;  %s1997_s21 = sadd.s32 4294967295, %s1929_s20   ;;  %s1929_s20 = sphi %s1976_s20, %s23_s20   ;;  %s1925_s19 = sphi %s1974_s19, %s2465_s19   ;;  %s1921_s18 = sphi %s1972_s18, %s2464_s18   ;;  %s1917_s17 = sphi %s1970_s17, %s2460_s17   ;;  %s1913_s16 = sphi %s1968_s16, %s2463_s16   ;;  %s1909_s15 = sphi %s1966_s15, %s2462_s15  }
   0xc   : > { %2442 = sst [smem:[#allocation15_spill]] %s1929_s20  ;;  %s1301_s22 = sadd.s32 4294967294, %s1929_s20  }
   0xd   : > { %p64_p0 = scmp.ne.s32.totalorder %s1913_s16, %s1909_s15  ;;  %p65_p1 = scmp.eq.s32.totalorder %s1997_s21, 0 }
   0xe   : > { %p176_p3 = scmp.eq.s32.totalorder %s1301_s22, 1  ;;  %p1302_p5 = scmp.ge.s32.totalorder %s1929_s20, 1 }
   0xf   : > { %p2006_p4 = por %p65_p1, %p64_p0  ;;  %p183_p7 = scmp.lt.s32.totalorder %s1929_s20, 3 }
  0x10   : > { %p2011_p6 = por %p176_p3, %p64_p0  ;;  %s1931_s26 = smov [#allocation8]  }
  0x11   : > { %p2016_p8 = pnand %p1302_p5, %p183_p7  ;;  %s198_s27 = sshll.u32 %s1931_s26, 4  ;;  %s199_s27 = int_to_ptr.vmem [resolvable:$true] %s198_s27 }
  0x12   : > { %s2444_s24 = scalar_select %p2011_p6, 1, 0 }
  0x13   : > { %p1685_p9 = pneg %p2016_p8  ;;  %p1305_p10 = scmp.ge.s32.totalorder %s1929_s20, 2 }
  0x14   : > { %s42_s29 = sadd.s32 1, %s1925_s19  ;;  %s1770_s30 = scalar_lea.vmem %s199_s27, 2048 }
  0x15   : > { %p2025_p11 = pnand %p1685_p9, %p65_p1  ;;  %p1771_p13 = scmp.ne.s32.totalorder %s199_s27, %s1770_s30 }
  0x16   : > { %p1778_p5 = scmp.lt.s32.totalorder %s199_s27, %s199_s27  ;;  %p1779_p7 = scmp.lt.s32.totalorder %s1770_s30, %s1770_s30 }
  0x17   : > { %p1761_p12 = pneg %p2025_p11 }
  0x18   : > { %p1780_p2 = por %p1779_p7, %p1778_p5 }
  0x19   : > { %p1773_p0 = pnand %p1771_p13, %p1761_p12 }
  0x1b   : > { %p1774_p3 = pneg %p1773_p0 }
  0x1d   : > { %p1781_p6 = pnand %p1780_p2, %p1774_p3 }
  0x1f   : > { %1784 = shalt.err (!%p1781_p6)
}
  0x20   : > { %s2431_s5 = smov 128   ;;  %s2433_s6 = smov 8  }
  0x21   : > { %s2447_s2 = sld [smem:[#allocation19_spill]]  ;;  %p44_p2 = scmp.ge.s32.totalorder %s42_s29, 2 }
  0x22   : > { %s51_s9 = sadd.s32 1, %s1917_s17  ;;  %p58_p6 = scmp.ne.s32.totalorder %s1917_s17, %s1913_s16 }
  0x23   : > { %p59_p9 = scmp.eq.s32.totalorder %s1929_s20, 0  ;;  %s2467_s29 = smov (%p44_p2, %s42_s29), 0 }
  0x24   : > { %2448 = sst [smem:[#allocation16_spill]] %s2467_s29  ;;  %p2450_p13 = scmp.eq.s32.totalorder %s1997_s21, 1 }
  0x25   : > { %p2046_p12 = por %p59_p9, %p58_p6  ;;  %s46_s12 = ssub.s32 %s1925_s19, %s2467_s29 }
  0x26   : > { %p2052_p0 = por %p2450_p13, %p58_p6  ;;  %p49_p3 = scmp.eq.s32.totalorder %s46_s12, 0 }
  0x27   : > { %1688 = dma.hbm_to_vmem [thread:$0]  (!%p2025_p11), %s2447_s2, 2048, %s199_s27, [#allocation7], %s2431_s5, %s2431_s5, %s2433_s6  }
  0x28   : > { %p1701_p11 = scmp.lt.s32.totalorder %s1929_s20, 2  ;;  %s2060_s13 = sand.u32 1, %s1917_s17  }
  0x29   : > { %s1306_s14 = sshll.u32 %s2060_s13, 4  ;;  %s1340_s26 = sshll.u32 %s1925_s19, 8 }
  0x2a   : > { %s2064_s22 = scalar_select %p49_p3, %s1917_s17, %s51_s9  }
  0x2b   : > { %s2453_s0 = sld [smem:[#allocation18_spill]]  ;;  %s223_s7 = scalar_lea.vmem [#allocation3], %s1306_s14 }
  0x2c   : > { %2452 = sst [smem:[#allocation17_spill]] %s2064_s22  ;;  %s232_s8 = sshll.u32 %s223_s7, 4  ;;  %s233_s8 = int_to_ptr.vmem [resolvable:$true] %s232_s8 }
  0x2d   : > { %p2072_p5 = pnand %p1701_p11, %p2046_p12  ;;  %s242_s12 = sand.u32 1, %s1929_s20  }
  0x2e   : > { %s1309_s6 = sshll.u32 %s2060_s13, 7  ;;  %s220_s2 = scalar_lea.sflag [#allocation4], %s2060_s13 }
  0x2f   : > { %p1787_p7 = pneg %p2072_p5  ;;  %s1798_s9 = scalar_lea.vmem %s233_s8, 256 }
  0x30   : > { %p1799_p2 = scmp.ne.s32.totalorder %s233_s8, %s1798_s9  ;;  %s1934_s14 = smov [#allocation3]  }
  0x31   : > { %s231_s30 = scalar_lea.hbm %s2453_s0, %s1340_s26  ;;  %s1803_s26 = sshll.u32 %s1934_s14, 4  ;;  %s1804_s26 = int_to_ptr.vmem [resolvable:$false] %s1803_s26 }
  0x32   : > { %p1801_p6 = pnand %p1799_p2, %p1787_p7  ;;  %s1805_s10 = scalar_lea.vmem %s1804_s26, 512 }
  0x33   : > { %p1806_p12 = scmp.lt.s32.totalorder %s233_s8, %s1804_s26  ;;  %p1807_p13 = scmp.lt.s32.totalorder %s1805_s10, %s1798_s9 }
  0x34   : > { %p1802_p9 = pneg %p1801_p6 }
  0x35   : > { %p1808_p11 = por %p1807_p13, %p1806_p12 }
  0x37   : > { %p1809_p3 = pnand %p1808_p11, %p1802_p9 }
  0x39   : > { %1812 = shalt.err (!%p1809_p3)
}
  0x3a   : > { %s2455_s13 = smov 8   ;;  %s2456_s27 = smov 128  }
  0x3b   : > { %1692 = dma.hbm_to_vmem [thread:$0]  (!%p2072_p5), %s231_s30, 256, %s233_s8, %s220_s2, %s2456_s27, %s2456_s27, %s2455_s13  }
  0x3c   : > { %s1341_s28 = sshll.u32 %s1925_s19, 11  ;;  %s246_s29 = scalar_lea.vmem [#allocation6], %s1309_s6 }
  0x3d   : > { %s252_s14 = scalar_lea.hbm %s2427_s1, %s1341_s28  ;;  %s253_s22 = sshll.u32 %s246_s29, 4  ;;  %s254_s22 = int_to_ptr.vmem [resolvable:$true] %s253_s22 }
  0x3e   : > { %s243_s9 = scalar_lea.sflag [#allocation7], %s242_s12  ;;  %s1826_s26 = scalar_lea.vmem %s254_s22, 2048 }
  0x3f   : > { %p1827_p2 = scmp.ne.s32.totalorder %s254_s22, %s1826_s26  ;;  %s1935_s10 = smov [#allocation6]  }
  0x40   : > { %s1831_s17 = sshll.u32 %s1935_s10, 4  ;;  %s1832_s17 = int_to_ptr.vmem [resolvable:$false] %s1831_s17 }
  0x41   : > { %p1829_p6 = pnand %p1827_p2, %p1787_p7  ;;  %s1833_s20 = scalar_lea.vmem %s1832_s17, 4096 }
  0x42   : > { %p1834_p12 = scmp.lt.s32.totalorder %s254_s22, %s1832_s17  ;;  %p1835_p13 = scmp.lt.s32.totalorder %s1833_s20, %s1826_s26 }
  0x43   : > { %p1830_p9 = pneg %p1829_p6 }
  0x44   : > { %p1836_p11 = por %p1835_p13, %p1834_p12 }
  0x46   : > { %p1837_p3 = pnand %p1836_p11, %p1830_p9 }
  0x48   : > { %1840 = shalt.err (!%p1837_p3)
}
  0x49   : > { %1695 = dma.hbm_to_vmem [thread:$0]  (!%p2072_p5), %s252_s14, 2048, %s254_s22, %s243_s9, %s2456_s27, %s2456_s27, %s2455_s13  }
  0x4a   : > { %265 = sbr.rel (%p2016_p8) target bundleno = 918 (0x396), region = 36  ;;  %s2104_s0 = sand.u32 (!%p2016_p8), 1, %s1913_s16  }
  0x4b   : > { %s1313_s2 = sshll.u32 (!%p2016_p8), %s2104_s0, 4  ;;  %s268_s17 = scalar_lea.sflag (!%p2016_p8), [#allocation4], %s2104_s0 }
  0x4c   : > { %s2108_s20 = scalar_lea.vmem (!%p2016_p8), [#allocation3], %s1313_s2 }
  0x4f   : > { %1892 = dma.done.wait (%p2006_p4), %s268_s17, 256  }
  0x50   : > { %1894 = vsyncadd (%p2006_p4), %s268_s17, 4294967040  ;;  %s276_s25 = sand.u32 1, %s1997_s21   ;;  %s1314_s29 = sshll.u32 %s2104_s0, 7 }
  0x51   : > { %s277_s5 = scalar_lea.sflag [#allocation7], %s276_s25  ;;  %s2116_s6 = scalar_lea.vmem [#allocation6], %s1314_s29 }
  0x52   : > { %1896 = dma.done.wait (%p2006_p4), %s277_s5, 2048  }
  0x53   : > { %1898 = vsyncadd (%p2006_p4), %s277_s5, 4294965248 }
  0x54   : > { %1900 = dma.done.wait (%p65_p1), [#allocation7], 2048  }
  0x55   : > { %1902 = vsyncadd (%p65_p1), [#allocation7], 4294965248  ;;  %v1936_v0 = vmov 0.0   ;;  %vm1937_vm0 = vmmov 0   ;;  %vm423_vm1 = vcmask 261120   ;;  %v422_v1 = vld [vmem:[#allocation8 + $0x18] sm:$0xff] }
  0x56   : > { %1456 = vmatprep.subr.mxu0 %v1936_v0  ;;  %1488 = vmatprep.mubr.msk.f32.mxu0 %vm1937_vm0, %v1936_v0  ;;  %v421_v2 = vld [vmem:[#allocation8 + $0x10] sm:$0xff]  ;;  %v420_v4 = vld [vmem:[#allocation8 + $0x8] sm:$0xff]  ;;  %v2134_v5 = vld [vmem:[%s2116_s6 + $0x78] sm:$0xff]  ;;  %s1316_s22 = sshll.u32 %s2104_s0, 6  ;;  %s1342_s12 = sshll.u32 %s1921_s18, 10 }
  0x57   : > { %1491 = vmatprep.subr.mxu1 %v422_v1  ;;  %v2129_v3 = vld [vmem:[%s2108_s20] sm:$0xff]  ;;  %1457 = vmatpush3.msra.mxu0 %v2134_v5  ;;  %v2142_v8 = vld [vmem:[%s2116_s6 + $0x68] sm:$0xff]  ;;  %v2155_v11 = vld [vmem:[%s2116_s6 + $0x58] sm:$0xff]  ;;  %s2326_s30 = scalar_lea.vmem [#allocation9], %s1316_s22  ;;  %s2376_s28 = scalar_lea.hbm %s2430_s4, %s1342_s12 }
  0x58   : > { %1492 = vmatpush3.msra.mxu1 %v422_v1  ;;  %1499 = vmatprep.mubr.msk.f32.mxu1 %vm423_vm1, %v2129_v3  ;;  %v2137_v6 = vld [vmem:[%s2116_s6 + $0x70] sm:$0xff]  ;;  %v419_v7 = vld [vmem:[#allocation8] sm:$0xff]  ;;  %v2146_v9 = vld [vmem:[%s2108_s20 + $0x8] sm:$0xff]  ;;  %s1159_s8 = sshll.u32 %s2326_s30, 4  ;;  %s1141_s7 = scalar_lea.sflag [#allocation5], %s2104_s0  ;;  %s2371_s8 = int_to_ptr.vmem [resolvable:$true] %s1159_s8 }
  0x59   : > { %1493 = vmatprep.subr.mxu1 %v421_v2  ;;  %1458 = vmatprep.subr.mxu0 %v1936_v0  ;;  %v2150_v10 = vld [vmem:[%s2116_s6 + $0x60] sm:$0xff]  ;;  %v2163_v12 = vld [vmem:[%s2116_s6 + $0x50] sm:$0xff]  ;;  %v2170_v13 = vld [vmem:[%s2116_s6 + $0x48] sm:$0xff]  ;;  %s1841_s14 = scalar_lea.vmem %s2371_s8, 1024  ;;  %s1938_s18 = smov [#allocation9]  }
  0x5a   : > { %1494 = vmatpush3.msra.mxu1 %v421_v2  ;;  %1459 = vmatpush3.msra.mxu0 %v2137_v6  ;;  %v2177_v14 = vld [vmem:[%s2116_s6 + $0x40] sm:$0xff]  ;;  %v2184_v15 = vld [vmem:[%s2116_s6 + $0x38] sm:$0xff]  ;;  %v2191_v16 = vld [vmem:[%s2116_s6 + $0x30] sm:$0xff]  ;;  %p1842_p1 = scmp.ne.s32.totalorder %s2371_s8, %s1841_s14  ;;  %s1845_s9 = sshll.u32 %s1938_s18, 4  ;;  %s1846_s9 = int_to_ptr.vmem [resolvable:$false] %s1845_s9 }
  0x5b   : > { %1495 = vmatprep.subr.mxu1 %v420_v4  ;;  %1460 = vmatprep.subr.mxu0 %v1936_v0  ;;  %v2198_v17 = vld [vmem:[%s2116_s6 + $0x28] sm:$0xff]  ;;  %v2205_v18 = vld [vmem:[%s2116_s6 + $0x20] sm:$0xff]  ;;  %v2212_v19 = vld [vmem:[%s2116_s6 + $0x18] sm:$0xff]  ;;  %s1847_s26 = scalar_lea.vmem %s1846_s9, 2048  ;;  %p1848_p5 = scmp.lt.s32.totalorder %s2371_s8, %s1846_s9 }
  0x5c   : > { %1496 = vmatpush3.msra.mxu1 %v420_v4  ;;  %1461 = vmatpush3.msra.mxu0 %v2142_v8  ;;  %v2219_v20 = vld [vmem:[%s2116_s6 + $0x10] sm:$0xff]  ;;  %v2226_v21 = vld [vmem:[%s2116_s6 + $0x8] sm:$0xff]  ;;  %v2233_v22 = vld [vmem:[%s2116_s6] sm:$0xff]  ;;  %p1843_p4 = pnand %p1842_p1, %p2052_p0  ;;  %p1849_p7 = scmp.lt.s32.totalorder %s1847_s26, %s1841_s14 }
  0x5d   : > { %1497 = vmatprep.subr.mxu1 %v419_v7  ;;  %1462 = vmatprep.subr.mxu0 %v1936_v0  ;;  %v329_v23 = vld [vmem:[%s2429_s3] sm:$0xf]  ;;  %v606_v27 = vld [vmem:[#allocation8 + $0x30] sm:$0xff]  ;;  %v605_v28 = vld [vmem:[#allocation8 + $0x28] sm:$0xff] }
  0x5e   : > { %1498 = vmatpush3.msra.mxu1 %v419_v7  ;;  %1463 = vmatpush3.msra.mxu0 %v2150_v10  ;;  %v607_v24 = vld [vmem:[#allocation8 + $0x38] sm:$0xff]  ;;  %v604_v29 = vld [vmem:[#allocation8 + $0x20] sm:$0xff]  ;;  %v785_v31 = vld [vmem:[#allocation8 + $0x50] sm:$0xff]  ;;  %p1844_p8 = pneg %p1843_p4  ;;  %p1850_p2 = por %p1849_p7, %p1848_p5 }
  0x5f   : > { %1500 = vmatmul.mubr.msk.f32.vlgmr.msra.gmra.mxu1 %vm423_vm1, %v2146_v9  ;;  %1502 = vmatprep.subr.mxu1 %v2134_v5  ;;  %v786_v30 = vld [vmem:[#allocation8 + $0x58] sm:$0xff]  ;;  %v784_v32 = vld [vmem:[#allocation8 + $0x48] sm:$0xff]  ;;  %v783_v33 = vld [vmem:[#allocation8 + $0x40] sm:$0xff] }
  0x60   : > { %1464 = vmatprep.subr.mxu0 %v1936_v0  ;;  %1503 = vmatpush3.msra.mxu1 %v2134_v5  ;;  %v965_v36 = vld [vmem:[#allocation8 + $0x78] sm:$0xff]  ;;  %v964_v46 = vld [vmem:[#allocation8 + $0x70] sm:$0xff]  ;;  %v963_v47 = vld [vmem:[#allocation8 + $0x68] sm:$0xff]  ;;  %p1851_p6 = pnand %p1850_p2, %p1844_p8 }
  0x61   : > { %1465 = vmatpush3.msra.mxu0 %v2155_v11  ;;  %1504 = vmatprep.subr.mxu1 %v2137_v6  ;;  %v962_v48 = vld [vmem:[#allocation8 + $0x60] sm:$0xff] }
  0x62   : > { %1466 = vmatprep.subr.mxu0 %v1936_v0  ;;  %1505 = vmatpush3.msra.mxu1 %v2137_v6 }
  0x63   : > { %1467 = vmatpush3.msra.mxu0 %v2163_v12  ;;  %1506 = vmatprep.subr.mxu1 %v2142_v8 }
  0x64   : > { %1468 = vmatprep.subr.mxu0 %v1936_v0  ;;  %1507 = vmatpush3.msra.mxu1 %v2142_v8 }
  0x65   : > { %1469 = vmatpush3.msra.mxu0 %v2170_v13  ;;  %1508 = vmatprep.subr.mxu1 %v2150_v10 }
  0x66   : > { %1470 = vmatprep.subr.mxu0 %v1936_v0  ;;  %1509 = vmatpush3.msra.mxu1 %v2150_v10 }
  0x67   : > { %1471 = vmatpush3.msra.mxu0 %v2177_v14  ;;  %1510 = vmatprep.subr.mxu1 %v2155_v11 }
  0x68   : > { %1472 = vmatprep.subr.mxu0 %v1936_v0  ;;  %1511 = vmatpush3.msra.mxu1 %v2155_v11 }
  0x69   : > { %1473 = vmatpush3.msra.mxu0 %v2184_v15  ;;  %1512 = vmatprep.subr.mxu1 %v2163_v12 }
  0x6a   : > { %1474 = vmatprep.subr.mxu0 %v1936_v0  ;;  %1513 = vmatpush3.msra.mxu1 %v2163_v12 }
  0x6b   : > { %1475 = vmatpush3.msra.mxu0 %v2191_v16  ;;  %1514 = vmatprep.subr.mxu1 %v2170_v13 }
  0x6c   : > { %1476 = vmatprep.subr.mxu0 %v1936_v0  ;;  %1515 = vmatpush3.msra.mxu1 %v2170_v13 }
  0x6d   : > { %1477 = vmatpush3.msra.mxu0 %v2198_v17  ;;  %1516 = vmatprep.subr.mxu1 %v2177_v14 }
  0x6e   : > { %1478 = vmatprep.subr.mxu0 %v1936_v0  ;;  %1517 = vmatpush3.msra.mxu1 %v2177_v14 }
  0x6f   : > { %1479 = vmatpush3.msra.mxu0 %v2205_v18  ;;  %1518 = vmatprep.subr.mxu1 %v2184_v15 }
  0x70   : > { %1480 = vmatprep.subr.mxu0 %v1936_v0  ;;  %1519 = vmatpush3.msra.mxu1 %v2184_v15 }
  0x71   : > { %1481 = vmatpush3.msra.mxu0 %v2212_v19  ;;  %1520 = vmatprep.subr.mxu1 %v2191_v16 }
  0x72   : > { %1482 = vmatprep.subr.mxu0 %v1936_v0  ;;  %1521 = vmatpush3.msra.mxu1 %v2191_v16 }
  0x73   : > { %1483 = vmatpush3.msra.mxu0 %v2219_v20  ;;  %1522 = vmatprep.subr.mxu1 %v2198_v17 }
  0x74   : > { %1484 = vmatprep.subr.mxu0 %v1936_v0  ;;  %1523 = vmatpush3.msra.mxu1 %v2198_v17 }
  0x75   : > { %1485 = vmatpush3.msra.mxu0 %v2226_v21  ;;  %1524 = vmatprep.subr.mxu1 %v2205_v18 }
  0x76   : > { %1486 = vmatprep.subr.mxu0 %v1936_v0  ;;  %1525 = vmatpush3.msra.mxu1 %v2205_v18 }
  0x77   : > { %1487 = vmatpush3.msra.mxu0 %v2233_v22  ;;  %1526 = vmatprep.subr.mxu1 %v2212_v19 }
  0x78   : > { %1489 = vmatmul.mubr.f32.vlgmr.msra.gmra.mxu0 %v329_v23  ;;  %1527 = vmatpush3.msra.mxu1 %v2212_v19 }
  0x79   : > { %1548 = vmatprep.subr.mxu0 %v2134_v5  ;;  %1528 = vmatprep.subr.mxu1 %v2219_v20 }
  0x7a   : > { %1549 = vmatpush3.msra.mxu0 %v2134_v5  ;;  %1529 = vmatpush3.msra.mxu1 %v2219_v20 }
  0x7b   : > { %1550 = vmatprep.subr.mxu0 %v2137_v6  ;;  %1530 = vmatprep.subr.mxu1 %v2226_v21 }
  0x7c   : > { %1551 = vmatpush3.msra.mxu0 %v2137_v6  ;;  %1531 = vmatpush3.msra.mxu1 %v2226_v21 }
  0x7d   : > { %1552 = vmatprep.subr.mxu0 %v2142_v8  ;;  %1532 = vmatprep.subr.mxu1 %v2233_v22 }
  0x7e   : > { %1553 = vmatpush3.msra.mxu0 %v2142_v8  ;;  %1533 = vmatpush3.msra.mxu1 %v2233_v22 }
  0x7f   : > { %1554 = vmatprep.subr.mxu0 %v2150_v10  ;;  %1537 = vmatprep.subr.mxu1 %v607_v24 }
  0x80   : > { %1555 = vmatpush3.msra.mxu0 %v2150_v10 }
  0x81   : > { %1556 = vmatprep.subr.mxu0 %v2155_v11 }
  0x82   : > { %1557 = vmatpush3.msra.mxu0 %v2155_v11 }
  0x83   : > { %1558 = vmatprep.subr.mxu0 %v2163_v12 }
  0x84   : > { %1559 = vmatpush3.msra.mxu0 %v2163_v12 }
  0x85   : > { %1560 = vmatprep.subr.mxu0 %v2170_v13 }
  0x86   : > { %1561 = vmatpush3.msra.mxu0 %v2170_v13 }
  0x87   : > { %1562 = vmatprep.subr.mxu0 %v2177_v14 }
  0x88   : > { %1563 = vmatpush3.msra.mxu0 %v2177_v14 }
  0x89   : > { %1564 = vmatprep.subr.mxu0 %v2184_v15 }
  0x8a   : > { %1565 = vmatpush3.msra.mxu0 %v2184_v15 }
  0x8b   : > { %1566 = vmatprep.subr.mxu0 %v2191_v16 }
  0x8c   : > { %1567 = vmatpush3.msra.mxu0 %v2191_v16 }
  0x8d   : > { %1568 = vmatprep.subr.mxu0 %v2198_v17 }
  0x8e   : > { %1569 = vmatpush3.msra.mxu0 %v2198_v17 }
  0x8f   : > { %1570 = vmatprep.subr.mxu0 %v2205_v18 }
  0x90   : > { %1571 = vmatpush3.msra.mxu0 %v2205_v18 }
  0x91   : > { %1572 = vmatprep.subr.mxu0 %v2212_v19 }
  0x92   : > { %1573 = vmatpush3.msra.mxu0 %v2212_v19 }
  0x93   : > { %1574 = vmatprep.subr.mxu0 %v2219_v20 }
  0x94   : > { %1575 = vmatpush3.msra.mxu0 %v2219_v20 }
  0x95   : > { %1576 = vmatprep.subr.mxu0 %v2226_v21 }
  0x96   : > { %1577 = vmatpush3.msra.mxu0 %v2226_v21 }
  0x97   : > { %1578 = vmatprep.subr.mxu0 %v2233_v22 }
  0x98   : > { %1579 = vmatpush3.msra.mxu0 %v2233_v22 }
  0x99   : > { %1640 = vmatprep.subr.mxu0 %v2134_v5 }
 0x11f   : > { %v1501_v25 = vpop.f32.mrf.mxu1 }
 0x121   : > { %v496_v26 = vpop.f32.mrf.mxu1 }
 0x122   : > { %1534 = vmatprep.mubr.f32.mxu1 %v496_v26 }
 0x123   : > { %1535 = vmatmul.mubr.f32.vlgmr.msra.gmra.mxu1 %v1501_v25 }
 0x124   : > { %1538 = vmatpush3.msra.mxu1 %v607_v24  ;;  %1545 = vmatprep.mubr.msk.f32.mxu1 %vm423_vm1, %v2129_v3 }
 0x125   : > { %1539 = vmatprep.subr.mxu1 %v606_v27 }
 0x126   : > { %1540 = vmatpush3.msra.mxu1 %v606_v27 }
 0x127   : > { %1541 = vmatprep.subr.mxu1 %v605_v28 }
 0x128   : > { %1542 = vmatpush3.msra.mxu1 %v605_v28 }
 0x129   : > { %1543 = vmatprep.subr.mxu1 %v604_v29 }
 0x12a   : > { %1544 = vmatpush3.msra.mxu1 %v604_v29 }
 0x12b   : > { %1546 = vmatmul.mubr.msk.f32.vlgmr.msra.gmra.mxu1 %vm423_vm1, %v2146_v9  ;;  %1583 = vmatprep.subr.mxu1 %v786_v30 }
 0x12c   : > { %1584 = vmatpush3.msra.mxu1 %v786_v30  ;;  %1591 = vmatprep.mubr.msk.f32.mxu1 %vm423_vm1, %v2129_v3 }
 0x12d   : > { %1585 = vmatprep.subr.mxu1 %v785_v31 }
 0x12e   : > { %1586 = vmatpush3.msra.mxu1 %v785_v31 }
 0x12f   : > { %1587 = vmatprep.subr.mxu1 %v784_v32 }
 0x130   : > { %1588 = vmatpush3.msra.mxu1 %v784_v32 }
 0x131   : > { %1589 = vmatprep.subr.mxu1 %v783_v33 }
 0x132   : > { %1590 = vmatpush3.msra.mxu1 %v783_v33 }
 0x133   : > { %1592 = vmatmul.mubr.msk.f32.vlgmr.msra.gmra.mxu1 %vm423_vm1, %v2146_v9  ;;  %1594 = vmatprep.subr.mxu1 %v2134_v5 }
 0x134   : > { %1595 = vmatpush3.msra.mxu1 %v2134_v5 }
 0x135   : > { %1596 = vmatprep.subr.mxu1 %v2137_v6 }
 0x136   : > { %1597 = vmatpush3.msra.mxu1 %v2137_v6 }
 0x137   : > { %1598 = vmatprep.subr.mxu1 %v2142_v8 }
 0x138   : > { %1599 = vmatpush3.msra.mxu1 %v2142_v8  ;;  %v412_v34 = vpop.f32.mrf.mxu0 }
 0x139   : > { %416 = vst [vmem:[#allocation2] sm:$0xf] %v412_v34  ;;  %1600 = vmatprep.subr.mxu1 %v2150_v10 }
 0x13a   : > { %1601 = vmatpush3.msra.mxu1 %v2150_v10  ;;  %v1490_v35 = vpop.f32.mrf.mxu0 }
 0x13b   : > { %1602 = vmatprep.subr.mxu1 %v2155_v11 }
 0x13c   : > { %1603 = vmatpush3.msra.mxu1 %v2155_v11 }
 0x13d   : > { %1604 = vmatprep.subr.mxu1 %v2163_v12 }
 0x13e   : > { %1605 = vmatpush3.msra.mxu1 %v2163_v12 }
 0x13f   : > { %1606 = vmatprep.subr.mxu1 %v2170_v13 }
 0x140   : > { %1607 = vmatpush3.msra.mxu1 %v2170_v13  ;;  %v1319_v37 = vld [vmem:[#allocation2] ss:$0 sm:$0xff]  ;;  %v1322_v49 = vld [vmem:[#allocation2 + $0x1] ss:$0 sm:$0xff]  ;;  %v1327_v54 = vld [vmem:[#allocation2 + $0x2] ss:$0 sm:$0xff] }
 0x141   : > { %1608 = vmatprep.subr.mxu1 %v2177_v14  ;;  %v1332_v62 = vld [vmem:[#allocation2 + $0x3] ss:$0 sm:$0xff] }
 0x142   : > { %1609 = vmatpush3.msra.mxu1 %v2177_v14 }
 0x143   : > { %1610 = vmatprep.subr.mxu1 %v2184_v15 }
 0x144   : > { %1611 = vmatpush3.msra.mxu1 %v2184_v15 }
 0x145   : > { %1612 = vmatprep.subr.mxu1 %v2191_v16 }
 0x146   : > { %1613 = vmatpush3.msra.mxu1 %v2191_v16 }
 0x147   : > { %1614 = vmatprep.subr.mxu1 %v2198_v17 }
 0x148   : > { %1615 = vmatpush3.msra.mxu1 %v2198_v17 }
 0x149   : > { %1616 = vmatprep.subr.mxu1 %v2205_v18 }
 0x14a   : > { %1617 = vmatpush3.msra.mxu1 %v2205_v18 }
 0x14b   : > { %1618 = vmatprep.subr.mxu1 %v2212_v19 }
 0x14c   : > { %1619 = vmatpush3.msra.mxu1 %v2212_v19 }
 0x14d   : > { %1620 = vmatprep.subr.mxu1 %v2219_v20 }
 0x14e   : > { %1621 = vmatpush3.msra.mxu1 %v2219_v20 }
 0x14f   : > { %1622 = vmatprep.subr.mxu1 %v2226_v21 }
 0x150   : > { %1623 = vmatpush3.msra.mxu1 %v2226_v21 }
 0x151   : > { %1624 = vmatprep.subr.mxu1 %v2233_v22 }
 0x152   : > { %1625 = vmatpush3.msra.mxu1 %v2233_v22 }
 0x153   : > { %1629 = vmatprep.subr.mxu1 %v965_v36 }
 0x1e3   : > { %v1536_v38 = vpop.f32.mrf.mxu1 }
 0x1e4   : > { %v598_v39 = vadd.f32 %v1536_v38, %v1319_v37 }
 0x1e5   : > { %v592_v40 = vpop.f32.mrf.mxu1 }
 0x1e6   : > { %602 = vst [vmem:[%s2326_s30 + $0x8] sm:$0xff] %v598_v39  ;;  %v593_v41 = vadd.f32 %v1319_v37, %v592_v40 }
 0x1e8   : > { %601 = vst [vmem:[%s2326_s30] sm:$0xff] %v593_v41 }
 0x1eb   : > { %v1547_v42 = vpop.f32.mrf.mxu1 }
 0x1ed   : > { %v674_v43 = vpop.f32.mrf.mxu1 }
 0x1ee   : > { %1580 = vmatprep.mubr.f32.mxu0 %v674_v43 }
 0x1ef   : > { %1581 = vmatmul.mubr.f32.vlgmr.msra.gmra.mxu0 %v1547_v42 }
 0x1f0   : > { %1641 = vmatpush3.msra.mxu0 %v2134_v5 }
 0x1f1   : > { %1642 = vmatprep.subr.mxu0 %v2137_v6 }
 0x1f2   : > { %1643 = vmatpush3.msra.mxu0 %v2137_v6 }
 0x1f3   : > { %v1593_v44 = vpop.f32.mrf.mxu1  ;;  %1644 = vmatprep.subr.mxu0 %v2142_v8 }
 0x1f4   : > { %1645 = vmatpush3.msra.mxu0 %v2142_v8 }
 0x1f5   : > { %v853_v45 = vpop.f32.mrf.mxu1  ;;  %1646 = vmatprep.subr.mxu0 %v2150_v10 }
 0x1f6   : > { %1626 = vmatprep.mubr.f32.mxu1 %v853_v45  ;;  %1647 = vmatpush3.msra.mxu0 %v2150_v10 }
 0x1f7   : > { %1627 = vmatmul.mubr.f32.vlgmr.msra.gmra.mxu1 %v1593_v44  ;;  %1648 = vmatprep.subr.mxu0 %v2155_v11 }
 0x1f8   : > { %1630 = vmatpush3.msra.mxu1 %v965_v36  ;;  %1637 = vmatprep.mubr.msk.f32.mxu1 %vm423_vm1, %v2129_v3 }
 0x1f9   : > { %1631 = vmatprep.subr.mxu1 %v964_v46  ;;  %1649 = vmatpush3.msra.mxu0 %v2155_v11 }
 0x1fa   : > { %1632 = vmatpush3.msra.mxu1 %v964_v46  ;;  %1650 = vmatprep.subr.mxu0 %v2163_v12 }
 0x1fb   : > { %1633 = vmatprep.subr.mxu1 %v963_v47  ;;  %1651 = vmatpush3.msra.mxu0 %v2163_v12 }
 0x1fc   : > { %1634 = vmatpush3.msra.mxu1 %v963_v47  ;;  %1652 = vmatprep.subr.mxu0 %v2170_v13 }
 0x1fd   : > { %1635 = vmatprep.subr.mxu1 %v962_v48  ;;  %1653 = vmatpush3.msra.mxu0 %v2170_v13 }
 0x1fe   : > { %1636 = vmatpush3.msra.mxu1 %v962_v48  ;;  %1654 = vmatprep.subr.mxu0 %v2177_v14 }
 0x1ff   : > { %1638 = vmatmul.mubr.msk.f32.vlgmr.msra.gmra.mxu1 %vm423_vm1, %v2146_v9  ;;  %1655 = vmatpush3.msra.mxu0 %v2177_v14 }
 0x200   : > { %1656 = vmatprep.subr.mxu0 %v2184_v15 }
 0x201   : > { %1657 = vmatpush3.msra.mxu0 %v2184_v15 }
 0x202   : > { %1658 = vmatprep.subr.mxu0 %v2191_v16 }
 0x203   : > { %1659 = vmatpush3.msra.mxu0 %v2191_v16 }
 0x204   : > { %1660 = vmatprep.subr.mxu0 %v2198_v17 }
 0x205   : > { %1661 = vmatpush3.msra.mxu0 %v2198_v17 }
 0x206   : > { %1662 = vmatprep.subr.mxu0 %v2205_v18 }
 0x207   : > { %1663 = vmatpush3.msra.mxu0 %v2205_v18 }
 0x208   : > { %1664 = vmatprep.subr.mxu0 %v2212_v19 }
 0x209   : > { %1665 = vmatpush3.msra.mxu0 %v2212_v19 }
 0x20a   : > { %1666 = vmatprep.subr.mxu0 %v2219_v20 }
 0x20b   : > { %1667 = vmatpush3.msra.mxu0 %v2219_v20 }
 0x20c   : > { %1668 = vmatprep.subr.mxu0 %v2226_v21 }
 0x20d   : > { %1669 = vmatpush3.msra.mxu0 %v2226_v21 }
 0x20e   : > { %1670 = vmatprep.subr.mxu0 %v2233_v22 }
 0x20f   : > { %1671 = vmatpush3.msra.mxu0 %v2233_v22 }
 0x2af   : > { %v1582_v50 = vpop.f32.mrf.mxu0 }
 0x2b0   : > { %v776_v51 = vadd.f32 %v1582_v50, %v1322_v49 }
 0x2b1   : > { %v770_v52 = vpop.f32.mrf.mxu0 }
 0x2b2   : > { %1324 = vst [vmem:[%s2326_s30 + $0x18] sm:$0xff] %v776_v51  ;;  %v771_v53 = vadd.f32 %v1322_v49, %v770_v52 }
 0x2b4   : > { %1323 = vst [vmem:[%s2326_s30 + $0x10] sm:$0xff] %v771_v53 }
 0x2b7   : > { %v1628_v55 = vpop.f32.mrf.mxu1 }
 0x2b8   : > { %v955_v56 = vadd.f32 %v1628_v55, %v1327_v54 }
 0x2b9   : > { %v949_v57 = vpop.f32.mrf.mxu1 }
 0x2ba   : > { %1329 = vst [vmem:[%s2326_s30 + $0x28] sm:$0xff] %v955_v56  ;;  %v950_v58 = vadd.f32 %v1327_v54, %v949_v57 }
 0x2bc   : > { %1328 = vst [vmem:[%s2326_s30 + $0x20] sm:$0xff] %v950_v58 }
 0x2bf   : > { %v1639_v59 = vpop.f32.mrf.mxu1 }
 0x2c1   : > { %v1032_v60 = vpop.f32.mrf.mxu1 }
 0x2c2   : > { %1672 = vmatprep.mubr.f32.mxu0 %v1032_v60 }
 0x2c3   : > { %1673 = vmatmul.mubr.f32.vlgmr.msra.gmra.mxu0 %v1639_v59 }
 0x383   : > { %v1674_v61 = vpop.f32.mrf.mxu0 }
 0x384   : > { %v1134_v63 = vadd.f32 %v1674_v61, %v1332_v62 }
 0x385   : > { %v1128_v0 = vpop.f32.mrf.mxu0 }
 0x386   : > { %1334 = vst [vmem:[%s2326_s30 + $0x38] sm:$0xff] %v1134_v63  ;;  %v1129_v1 = vadd.f32 %v1332_v62, %v1128_v0 }
 0x388   : > { %1333 = vst [vmem:[%s2326_s30 + $0x30] sm:$0xff] %v1129_v1 }
 0x389   : > { %1854 = shalt.err (!%p1851_p6)
}
 0x38a   : > { %s1855_s10 = scalar_lea.hbm %s2376_s28, 1024  ;;  %s1859_s20 = scalar_lea.hbm %s2430_s4, 2048 }
 0x38b   : > { %p1856_p9 = scmp.ne.s32.totalorder %s2376_s28, %s1855_s10  ;;  %p1860_p11 = scmp.lt.s32.totalorder %s2376_s28, %s2430_s4 }
 0x38c   : > { %p1861_p3 = scmp.lt.s32.totalorder %s1859_s20, %s1855_s10 }
 0x38d   : > { %p1857_p12 = pnand %p1856_p9, %p2052_p0 }
 0x38e   : > { %p1862_p1 = por %p1861_p3, %p1860_p11 }
 0x38f   : > { %p1858_p13 = pneg %p1857_p12 }
 0x391   : > { %p1863_p4 = pnand %p1862_p1, %p1858_p13 }
 0x393   : > { %1866 = shalt.err (!%p1863_p4)
}
 0x394   : > { %s1939_s5 = smov 128   ;;  %s1940_s6 = smov 8  }
 0x395   : > { %1683 = dma.vmem_to_hbm [thread:$0]  (%p2052_p0), %s2371_s8, 1024, %s2376_s28, %s1141_s7, %s1939_s5, %s1939_s5, %s1940_s6  }
 0x396 PF: > { %s2457_s21 = sld [smem:[#allocation15_spill]]  ;;  %s1174_s23 = sand.u32 1, %s1909_s15  }
 0x397   : > { %p2458_p8 = scmp.ne.s32.totalorder %s2444_s24, 0  ;;  %s1175_s22 = scalar_lea.sflag [#allocation5], %s1174_s23 }
 0x399   : > { %p1697_p5 = pnand %p1305_p10, %p2458_p8 }
 0x39b   : > { %p1698_p7 = pneg %p1697_p5 }
 0x39d   : > { %1904 = dma.done.wait (%p1698_p7), %s1175_s22, 1024  }
 0x39e   : > { %1906 = vsyncadd (%p1698_p7), %s1175_s22, 4294966272  ;;  %s23_s20 = sadd.s32 1, %s2457_s21   ;;  %s2459_s30 = sld [smem:[#allocation14_spill]] }
 0x39f   : > { %p20_p2 = scmp.ge.s32.totalorder %s23_s20, 4   ;;  %s2460_s17 = sld [smem:[#allocation17_spill]] }
 0x3a0   : > { %s2461_s11 = sld [smem:[#allocation16_spill]]  ;;  %s2462_s15 = smov %s1913_s16 }
 0x3a1   : > { %s2464_s18 = smov %s1925_s19 }
 0x3a2   :  { %22 = sbr.rel (!%p20_p2) target bundleno = 11 (0xb), region = 112 }
 0x3a4   : > { %s2463_s16 = smov %s2459_s30 }
 0x3a6   : > { %s2465_s19 = smov %s2461_s11 }
 0x3a7   :  { %1180 = vsyncpa [#allocation4], 1 }
 0x3a8   :  { %1182 = vsyncpa [#allocation4 + $0x1], 1 }
 0x3a9   :  { %1183 = vsyncpa [#allocation7], 1 }
 0x3aa   :  { %1185 = vsyncpa [#allocation7 + $0x1], 1 }
 0x3ab   :  { %1186 = vsyncpa [#allocation5], 1 }
 0x3ac   :  { %1188 = vsyncpa [#allocation5 + $0x1], 1 }

// kernel: tpu_custom_call.1
= control target key start
LH: loop header
LB: loop body
LE: loop exit
PB: predicated region body
PF: predicated region fallthrough
CT: control target
= control target key end

     0   :  { %s2426_s0 = inlined_call_operand.hbm [shape: f32[2,16,32], index: 0, kind: input, shape index: {}]   ;;  %s2427_s1 = inlined_call_operand.hbm [shape: f32[2,128,128], index: 1, kind: input, shape index: {}]   ;;  %s2428_s2 = inlined_call_operand.hbm [shape: f32[1,4,32,128], index: 2, kind: input, shape index: {}]   ;;  %s2429_s3 = inlined_call_operand.vmem [shape: f32[1,4,128], index: 3, kind: input, shape index: {}]   ;;  %s2430_s4 = inlined_call_operand.hbm [shape: f32[2,4,16,128], index: 4, kind: output, shape index: {}]  }
   0x1   :  { %2439 = sst [smem:[#allocation18_spill]] %s2426_s0 }
   0x2   :  { %2440 = sst [smem:[#allocation19_spill]] %s2428_s2 }
   0x3   :  { %9 = vsyncpa [#allocation4], 0 }
   0x4   :  { %11 = vsyncpa [#allocation4 + $0x1], 0 }
   0x5   :  { %12 = vsyncpa [#allocation7], 0 }
   0x6   :  { %14 = vsyncpa [#allocation7 + $0x1], 0 }
   0x7   :  { %15 = vsyncpa [#allocation5], 0 }
   0x8   :  { %17 = vsyncpa [#allocation5 + $0x1], 0  ;;  %s1966_s15 = smov 0   ;;  %s1968_s16 = smov 0  }
   0x9   :  { %s1970_s17 = smov 0   ;;  %s1972_s18 = smov 0  }
   0xa   :  { %s1974_s19 = smov 0   ;;  %s1976_s20 = smov 0  }
   0xb LB: > { %2441 = sst [smem:[#allocation14_spill]] %s1917_s17  ;;  %s1997_s21 = sadd.s32 4294967295, %s1929_s20   ;;  %s1929_s20 = sphi %s1976_s20, %s23_s20   ;;  %s1925_s19 = sphi %s1974_s19, %s2465_s19   ;;  %s1921_s18 = sphi %s1972_s18, %s2464_s18   ;;  %s1917_s17 = sphi %s1970_s17, %s2460_s17   ;;  %s1913_s16 = sphi %s1968_s16, %s2463_s16   ;;  %s1909_s15 = sphi %s1966_s15, %s2462_s15  }
   0xc   : > { %2442 = sst [smem:[#allocation15_spill]] %s1929_s20  ;;  %s1301_s22 = sadd.s32 4294967294, %s1929_s20  }
   0xd   : > { %p64_p0 = scmp.ne.s32.totalorder %s1913_s16, %s1909_s15  ;;  %p65_p1 = scmp.eq.s32.totalorder %s1997_s21, 0 }
   0xe   : > { %p176_p3 = scmp.eq.s32.totalorder %s1301_s22, 1  ;;  %p1302_p5 = scmp.ge.s32.totalorder %s1929_s20, 1 }
   0xf   : > { %p2006_p4 = por %p65_p1, %p64_p0  ;;  %p183_p7 = scmp.lt.s32.totalorder %s1929_s20, 3 }
  0x10   : > { %p2011_p6 = por %p176_p3, %p64_p0  ;;  %s1931_s26 = smov [#allocation8]  }
  0x11   : > { %p2016_p8 = pnand %p1302_p5, %p183_p7  ;;  %s198_s27 = sshll.u32 %s1931_s26, 4  ;;  %s199_s27 = int_to_ptr.vmem [resolvable:$true] %s198_s27 }
  0x12   : > { %s2444_s24 = scalar_select %p2011_p6, 1, 0 }
  0x13   : > { %p1685_p9 = pneg %p2016_p8  ;;  %p1305_p10 = scmp.ge.s32.totalorder %s1929_s20, 2 }
  0x14   : > { %s42_s29 = sadd.s32 1, %s1925_s19  ;;  %s1770_s30 = scalar_lea.vmem %s199_s27, 2048 }
  0x15   : > { %p2025_p11 = pnand %p1685_p9, %p65_p1  ;;  %p1771_p13 = scmp.ne.s32.totalorder %s199_s27, %s1770_s30 }
  0x16   : > { %p1778_p5 = scmp.lt.s32.totalorder %s199_s27, %s199_s27  ;;  %p1779_p7 = scmp.lt.s32.totalorder %s1770_s30, %s1770_s30 }
  0x17   : > { %p1761_p12 = pneg %p2025_p11 }
  0x18   : > { %p1780_p2 = por %p1779_p7, %p1778_p5 }
  0x19   : > { %p1773_p0 = pnand %p1771_p13, %p1761_p12 }
  0x1b   : > { %p1774_p3 = pneg %p1773_p0 }
  0x1d   : > { %p1781_p6 = pnand %p1780_p2, %p1774_p3 }
  0x1f   : > { %1784 = shalt.err (!%p1781_p6)
}
  0x20   : > { %s2431_s5 = smov 128   ;;  %s2433_s6 = smov 8  }
  0x21   : > { %s2447_s2 = sld [smem:[#allocation19_spill]]  ;;  %p44_p2 = scmp.ge.s32.totalorder %s42_s29, 2 }
  0x22   : > { %s51_s9 = sadd.s32 1, %s1917_s17  ;;  %p58_p6 = scmp.ne.s32.totalorder %s1917_s17, %s1913_s16 }
  0x23   : > { %p59_p9 = scmp.eq.s32.totalorder %s1929_s20, 0  ;;  %s2467_s29 = smov (%p44_p2, %s42_s29), 0 }
  0x24   : > { %2448 = sst [smem:[#allocation16_spill]] %s2467_s29  ;;  %p2450_p13 = scmp.eq.s32.totalorder %s1997_s21, 1 }
  0x25   : > { %p2046_p12 = por %p59_p9, %p58_p6  ;;  %s46_s12 = ssub.s32 %s1925_s19, %s2467_s29 }
  0x26   : > { %p2052_p0 = por %p2450_p13, %p58_p6  ;;  %p49_p3 = scmp.eq.s32.totalorder %s46_s12, 0 }
  0x27   : > { %1688 = dma.hbm_to_vmem [thread:$0]  (!%p2025_p11), %s2447_s2, 2048, %s199_s27, [#allocation7], %s2431_s5, %s2431_s5, %s2433_s6  }
  0x28   : > { %p1701_p11 = scmp.lt.s32.totalorder %s1929_s20, 2  ;;  %s2060_s13 = sand.u32 1, %s1917_s17  }
  0x29   : > { %s1306_s14 = sshll.u32 %s2060_s13, 4  ;;  %s1340_s26 = sshll.u32 %s1925_s19, 8 }
  0x2a   : > { %s2064_s22 = scalar_select %p49_p3, %s1917_s17, %s51_s9  }
  0x2b   : > { %s2453_s0 = sld [smem:[#allocation18_spill]]  ;;  %s223_s7 = scalar_lea.vmem [#allocation3], %s1306_s14 }
  0x2c   : > { %2452 = sst [smem:[#allocation17_spill]] %s2064_s22  ;;  %s232_s8 = sshll.u32 %s223_s7, 4  ;;  %s233_s8 = int_to_ptr.vmem [resolvable:$true] %s232_s8 }
  0x2d   : > { %p2072_p5 = pnand %p1701_p11, %p2046_p12  ;;  %s242_s12 = sand.u32 1, %s1929_s20  }
  0x2e   : > { %s1309_s6 = sshll.u32 %s2060_s13, 7  ;;  %s220_s2 = scalar_lea.sflag [#allocation4], %s2060_s13 }
  0x2f   : > { %p1787_p7 = pneg %p2072_p5  ;;  %s1798_s9 = scalar_lea.vmem %s233_s8, 256 }
  0x30   : > { %p1799_p2 = scmp.ne.s32.totalorder %s233_s8, %s1798_s9  ;;  %s1934_s14 = smov [#allocation3]  }
  0x31   : > { %s231_s30 = scalar_lea.hbm %s2453_s0, %s1340_s26  ;;  %s1803_s26 = sshll.u32 %s1934_s14, 4  ;;  %s1804_s26 = int_to_ptr.vmem [resolvable:$false] %s1803_s26 }
  0x32   : > { %p1801_p6 = pnand %p1799_p2, %p1787_p7  ;;  %s1805_s10 = scalar_lea.vmem %s1804_s26, 512 }
  0x33   : > { %p1806_p12 = scmp.lt.s32.totalorder %s233_s8, %s1804_s26  ;;  %p1807_p13 = scmp.lt.s32.totalorder %s1805_s10, %s1798_s9 }
  0x34   : > { %p1802_p9 = pneg %p1801_p6 }
  0x35   : > { %p1808_p11 = por %p1807_p13, %p1806_p12 }
  0x37   : > { %p1809_p3 = pnand %p1808_p11, %p1802_p9 }
  0x39   : > { %1812 = shalt.err (!%p1809_p3)
}
  0x3a   : > { %s2455_s13 = smov 8   ;;  %s2456_s27 = smov 128  }
  0x3b   : > { %1692 = dma.hbm_to_vmem [thread:$0]  (!%p2072_p5), %s231_s30, 256, %s233_s8, %s220_s2, %s2456_s27, %s2456_s27, %s2455_s13  }
  0x3c   : > { %s1341_s28 = sshll.u32 %s1925_s19, 11  ;;  %s246_s29 = scalar_lea.vmem [#allocation6], %s1309_s6 }
  0x3d   : > { %s252_s14 = scalar_lea.hbm %s2427_s1, %s1341_s28  ;;  %s253_s22 = sshll.u32 %s246_s29, 4  ;;  %s254_s22 = int_to_ptr.vmem [resolvable:$true] %s253_s22 }
  0x3e   : > { %s243_s9 = scalar_lea.sflag [#allocation7], %s242_s12  ;;  %s1826_s26 = scalar_lea.vmem %s254_s22, 2048 }
  0x3f   : > { %p1827_p2 = scmp.ne.s32.totalorder %s254_s22, %s1826_s26  ;;  %s1935_s10 = smov [#allocation6]  }
  0x40   : > { %s1831_s17 = sshll.u32 %s1935_s10, 4  ;;  %s1832_s17 = int_to_ptr.vmem [resolvable:$false] %s1831_s17 }
  0x41   : > { %p1829_p6 = pnand %p1827_p2, %p1787_p7  ;;  %s1833_s20 = scalar_lea.vmem %s1832_s17, 4096 }
  0x42   : > { %p1834_p12 = scmp.lt.s32.totalorder %s254_s22, %s1832_s17  ;;  %p1835_p13 = scmp.lt.s32.totalorder %s1833_s20, %s1826_s26 }
  0x43   : > { %p1830_p9 = pneg %p1829_p6 }
  0x44   : > { %p1836_p11 = por %p1835_p13, %p1834_p12 }
  0x46   : > { %p1837_p3 = pnand %p1836_p11, %p1830_p9 }
  0x48   : > { %1840 = shalt.err (!%p1837_p3)
}
  0x49   : > { %1695 = dma.hbm_to_vmem [thread:$0]  (!%p2072_p5), %s252_s14, 2048, %s254_s22, %s243_s9, %s2456_s27, %s2456_s27, %s2455_s13  }
  0x4a   : > { %265 = sbr.rel (%p2016_p8) target bundleno = 918 (0x396), region = 36  ;;  %s2104_s0 = sand.u32 (!%p2016_p8), 1, %s1913_s16  }
  0x4b   : > { %s1313_s2 = sshll.u32 (!%p2016_p8), %s2104_s0, 4  ;;  %s268_s17 = scalar_lea.sflag (!%p2016_p8), [#allocation4], %s2104_s0 }
  0x4c   : > { %s2108_s20 = scalar_lea.vmem (!%p2016_p8), [#allocation3], %s1313_s2 }
  0x4f   : > { %1892 = dma.done.wait (%p2006_p4), %s268_s17, 256  }
  0x50   : > { %1894 = vsyncadd (%p2006_p4), %s268_s17, 4294967040  ;;  %s276_s25 = sand.u32 1, %s1997_s21   ;;  %s1314_s29 = sshll.u32 %s2104_s0, 7 }
  0x51   : > { %s277_s5 = scalar_lea.sflag [#allocation7], %s276_s25  ;;  %s2116_s6 = scalar_lea.vmem [#allocation6], %s1314_s29 }
  0x52   : > { %1896 = dma.done.wait (%p2006_p4), %s277_s5, 2048  }
  0x53   : > { %1898 = vsyncadd (%p2006_p4), %s277_s5, 4294965248 }
  0x54   : > { %1900 = dma.done.wait (%p65_p1), [#allocation7], 2048  }
  0x55   : > { %1902 = vsyncadd (%p65_p1), [#allocation7], 4294965248  ;;  %v1936_v0 = vmov 0.0   ;;  %vm1937_vm0 = vmmov 0   ;;  %vm423_vm1 = vcmask 261120   ;;  %v422_v1 = vld [vmem:[#allocation8 + $0x18] sm:$0xff] }
  0x56   : > { %1456 = vmatprep.subr.mxu0 %v1936_v0  ;;  %1488 = vmatprep.mubr.msk.f32.mxu0 %vm1937_vm0, %v1936_v0  ;;  %v421_v2 = vld [vmem:[#allocation8 + $0x10] sm:$0xff]  ;;  %v420_v4 = vld [vmem:[#allocation8 + $0x8] sm:$0xff]  ;;  %v2134_v5 = vld [vmem:[%s2116_s6 + $0x78] sm:$0xff]  ;;  %s1316_s22 = sshll.u32 %s2104_s0, 6  ;;  %s1342_s12 = sshll.u32 %s1921_s18, 10 }
  0x57   : > { %1491 = vmatprep.subr.mxu1 %v422_v1  ;;  %v2129_v3 = vld [vmem:[%s2108_s20] sm:$0xff]  ;;  %1457 = vmatpush3.msra.mxu0 %v2134_v5  ;;  %v2142_v8 = vld [vmem:[%s2116_s6 + $0x68] sm:$0xff]  ;;  %v2155_v11 = vld [vmem:[%s2116_s6 + $0x58] sm:$0xff]  ;;  %s2326_s30 = scalar_lea.vmem [#allocation9], %s1316_s22  ;;  %s2376_s28 = scalar_lea.hbm %s2430_s4, %s1342_s12 }
  0x58   : > { %1492 = vmatpush3.msra.mxu1 %v422_v1  ;;  %1499 = vmatprep.mubr.msk.f32.mxu1 %vm423_vm1, %v2129_v3  ;;  %v2137_v6 = vld [vmem:[%s2116_s6 + $0x70] sm:$0xff]  ;;  %v419_v7 = vld [vmem:[#allocation8] sm:$0xff]  ;;  %v2146_v9 = vld [vmem:[%s2108_s20 + $0x8] sm:$0xff]  ;;  %s1159_s8 = sshll.u32 %s2326_s30, 4  ;;  %s1141_s7 = scalar_lea.sflag [#allocation5], %s2104_s0  ;;  %s2371_s8 = int_to_ptr.vmem [resolvable:$true] %s1159_s8 }
  0x59   : > { %1493 = vmatprep.subr.mxu1 %v421_v2  ;;  %1458 = vmatprep.subr.mxu0 %v1936_v0  ;;  %v2150_v10 = vld [vmem:[%s2116_s6 + $0x60] sm:$0xff]  ;;  %v2163_v12 = vld [vmem:[%s2116_s6 + $0x50] sm:$0xff]  ;;  %v2170_v13 = vld [vmem:[%s2116_s6 + $0x48] sm:$0xff]  ;;  %s1841_s14 = scalar_lea.vmem %s2371_s8, 1024  ;;  %s1938_s18 = smov [#allocation9]  }
  0x5a   : > { %1494 = vmatpush3.msra.mxu1 %v421_v2  ;;  %1459 = vmatpush3.msra.mxu0 %v2137_v6  ;;  %v2177_v14 = vld [vmem:[%s2116_s6 + $0x40] sm:$0xff]  ;;  %v2184_v15 = vld [vmem:[%s2116_s6 + $0x38] sm:$0xff]  ;;  %v2191_v16 = vld [vmem:[%s2116_s6 + $0x30] sm:$0xff]  ;;  %p1842_p1 = scmp.ne.s32.totalorder %s2371_s8, %s1841_s14  ;;  %s1845_s9 = sshll.u32 %s1938_s18, 4  ;;  %s1846_s9 = int_to_ptr.vmem [resolvable:$false] %s1845_s9 }
  0x5b   : > { %1495 = vmatprep.subr.mxu1 %v420_v4  ;;  %1460 = vmatprep.subr.mxu0 %v1936_v0  ;;  %v2198_v17 = vld [vmem:[%s2116_s6 + $0x28] sm:$0xff]  ;;  %v2205_v18 = vld [vmem:[%s2116_s6 + $0x20] sm:$0xff]  ;;  %v2212_v19 = vld [vmem:[%s2116_s6 + $0x18] sm:$0xff]  ;;  %s1847_s26 = scalar_lea.vmem %s1846_s9, 2048  ;;  %p1848_p5 = scmp.lt.s32.totalorder %s2371_s8, %s1846_s9 }
  0x5c   : > { %1496 = vmatpush3.msra.mxu1 %v420_v4  ;;  %1461 = vmatpush3.msra.mxu0 %v2142_v8  ;;  %v2219_v20 = vld [vmem:[%s2116_s6 + $0x10] sm:$0xff]  ;;  %v2226_v21 = vld [vmem:[%s2116_s6 + $0x8] sm:$0xff]  ;;  %v2233_v22 = vld [vmem:[%s2116_s6] sm:$0xff]  ;;  %p1843_p4 = pnand %p1842_p1, %p2052_p0  ;;  %p1849_p7 = scmp.lt.s32.totalorder %s1847_s26, %s1841_s14 }
  0x5d   : > { %1497 = vmatprep.subr.mxu1 %v419_v7  ;;  %1462 = vmatprep.subr.mxu0 %v1936_v0  ;;  %v329_v23 = vld [vmem:[%s2429_s3] sm:$0xf]  ;;  %v606_v27 = vld [vmem:[#allocation8 + $0x30] sm:$0xff]  ;;  %v605_v28 = vld [vmem:[#allocation8 + $0x28] sm:$0xff] }
  0x5e   : > { %1498 = vmatpush3.msra.mxu1 %v419_v7  ;;  %1463 = vmatpush3.msra.mxu0 %v2150_v10  ;;  %v607_v24 = vld [vmem:[#allocation8 + $0x38] sm:$0xff]  ;;  %v604_v29 = vld [vmem:[#allocation8 + $0x20] sm:$0xff]  ;;  %v785_v31 = vld [vmem:[#allocation8 + $0x50] sm:$0xff]  ;;  %p1844_p8 = pneg %p1843_p4  ;;  %p1850_p2 = por %p1849_p7, %p1848_p5 }
  0x5f   : > { %1500 = vmatmul.mubr.msk.f32.vlgmr.msra.gmra.mxu1 %vm423_vm1, %v2146_v9  ;;  %1502 = vmatprep.subr.mxu1 %v2134_v5  ;;  %v786_v30 = vld [vmem:[#allocation8 + $0x58] sm:$0xff]  ;;  %v784_v32 = vld [vmem:[#allocation8 + $0x48] sm:$0xff]  ;;  %v783_v33 = vld [vmem:[#allocation8 + $0x40] sm:$0xff] }
  0x60   : > { %1464 = vmatprep.subr.mxu0 %v1936_v0  ;;  %1503 = vmatpush3.msra.mxu1 %v2134_v5  ;;  %v965_v36 = vld [vmem:[#allocation8 + $0x78] sm:$0xff]  ;;  %v964_v46 = vld [vmem:[#allocation8 + $0x70] sm:$0xff]  ;;  %v963_v47 = vld [vmem:[#allocation8 + $0x68] sm:$0xff]  ;;  %p1851_p6 = pnand %p1850_p2, %p1844_p8 }
  0x61   : > { %1465 = vmatpush3.msra.mxu0 %v2155_v11  ;;  %1504 = vmatprep.subr.mxu1 %v2137_v6  ;;  %v962_v48 = vld [vmem:[#allocation8 + $0x60] sm:$0xff] }
  0x62   : > { %1466 = vmatprep.subr.mxu0 %v1936_v0  ;;  %1505 = vmatpush3.msra.mxu1 %v2137_v6 }
  0x63   : > { %1467 = vmatpush3.msra.mxu0 %v2163_v12  ;;  %1506 = vmatprep.subr.mxu1 %v2142_v8 }
  0x64   : > { %1468 = vmatprep.subr.mxu0 %v1936_v0  ;;  %1507 = vmatpush3.msra.mxu1 %v2142_v8 }
  0x65   : > { %1469 = vmatpush3.msra.mxu0 %v2170_v13  ;;  %1508 = vmatprep.subr.mxu1 %v2150_v10 }
  0x66   : > { %1470 = vmatprep.subr.mxu0 %v1936_v0  ;;  %1509 = vmatpush3.msra.mxu1 %v2150_v10 }
  0x67   : > { %1471 = vmatpush3.msra.mxu0 %v2177_v14  ;;  %1510 = vmatprep.subr.mxu1 %v2155_v11 }
  0x68   : > { %1472 = vmatprep.subr.mxu0 %v1936_v0  ;;  %1511 = vmatpush3.msra.mxu1 %v2155_v11 }
  0x69   : > { %1473 = vmatpush3.msra.mxu0 %v2184_v15  ;;  %1512 = vmatprep.subr.mxu1 %v2163_v12 }
  0x6a   : > { %1474 = vmatprep.subr.mxu0 %v1936_v0  ;;  %1513 = vmatpush3.msra.mxu1 %v2163_v12 }
  0x6b   : > { %1475 = vmatpush3.msra.mxu0 %v2191_v16  ;;  %1514 = vmatprep.subr.mxu1 %v2170_v13 }
  0x6c   : > { %1476 = vmatprep.subr.mxu0 %v1936_v0  ;;  %1515 = vmatpush3.msra.mxu1 %v2170_v13 }
  0x6d   : > { %1477 = vmatpush3.msra.mxu0 %v2198_v17  ;;  %1516 = vmatprep.subr.mxu1 %v2177_v14 }
  0x6e   : > { %1478 = vmatprep.subr.mxu0 %v1936_v0  ;;  %1517 = vmatpush3.msra.mxu1 %v2177_v14 }
  0x6f   : > { %1479 = vmatpush3.msra.mxu0 %v2205_v18  ;;  %1518 = vmatprep.subr.mxu1 %v2184_v15 }
  0x70   : > { %1480 = vmatprep.subr.mxu0 %v1936_v0  ;;  %1519 = vmatpush3.msra.mxu1 %v2184_v15 }
  0x71   : > { %1481 = vmatpush3.msra.mxu0 %v2212_v19  ;;  %1520 = vmatprep.subr.mxu1 %v2191_v16 }
  0x72   : > { %1482 = vmatprep.subr.mxu0 %v1936_v0  ;;  %1521 = vmatpush3.msra.mxu1 %v2191_v16 }
  0x73   : > { %1483 = vmatpush3.msra.mxu0 %v2219_v20  ;;  %1522 = vmatprep.subr.mxu1 %v2198_v17 }
  0x74   : > { %1484 = vmatprep.subr.mxu0 %v1936_v0  ;;  %1523 = vmatpush3.msra.mxu1 %v2198_v17 }
  0x75   : > { %1485 = vmatpush3.msra.mxu0 %v2226_v21  ;;  %1524 = vmatprep.subr.mxu1 %v2205_v18 }
  0x76   : > { %1486 = vmatprep.subr.mxu0 %v1936_v0  ;;  %1525 = vmatpush3.msra.mxu1 %v2205_v18 }
  0x77   : > { %1487 = vmatpush3.msra.mxu0 %v2233_v22  ;;  %1526 = vmatprep.subr.mxu1 %v2212_v19 }
  0x78   : > { %1489 = vmatmul.mubr.f32.vlgmr.msra.gmra.mxu0 %v329_v23  ;;  %1527 = vmatpush3.msra.mxu1 %v2212_v19 }
  0x79   : > { %1548 = vmatprep.subr.mxu0 %v2134_v5  ;;  %1528 = vmatprep.subr.mxu1 %v2219_v20 }
  0x7a   : > { %1549 = vmatpush3.msra.mxu0 %v2134_v5  ;;  %1529 = vmatpush3.msra.mxu1 %v2219_v20 }
  0x7b   : > { %1550 = vmatprep.subr.mxu0 %v2137_v6  ;;  %1530 = vmatprep.subr.mxu1 %v2226_v21 }
  0x7c   : > { %1551 = vmatpush3.msra.mxu0 %v2137_v6  ;;  %1531 = vmatpush3.msra.mxu1 %v2226_v21 }
  0x7d   : > { %1552 = vmatprep.subr.mxu0 %v2142_v8  ;;  %1532 = vmatprep.subr.mxu1 %v2233_v22 }
  0x7e   : > { %1553 = vmatpush3.msra.mxu0 %v2142_v8  ;;  %1533 = vmatpush3.msra.mxu1 %v2233_v22 }
  0x7f   : > { %1554 = vmatprep.subr.mxu0 %v2150_v10  ;;  %1537 = vmatprep.subr.mxu1 %v607_v24 }
  0x80   : > { %1555 = vmatpush3.msra.mxu0 %v2150_v10 }
  0x81   : > { %1556 = vmatprep.subr.mxu0 %v2155_v11 }
  0x82   : > { %1557 = vmatpush3.msra.mxu0 %v2155_v11 }
  0x83   : > { %1558 = vmatprep.subr.mxu0 %v2163_v12 }
  0x84   : > { %1559 = vmatpush3.msra.mxu0 %v2163_v12 }
  0x85   : > { %1560 = vmatprep.subr.mxu0 %v2170_v13 }
  0x86   : > { %1561 = vmatpush3.msra.mxu0 %v2170_v13 }
  0x87   : > { %1562 = vmatprep.subr.mxu0 %v2177_v14 }
  0x88   : > { %1563 = vmatpush3.msra.mxu0 %v2177_v14 }
  0x89   : > { %1564 = vmatprep.subr.mxu0 %v2184_v15 }
  0x8a   : > { %1565 = vmatpush3.msra.mxu0 %v2184_v15 }
  0x8b   : > { %1566 = vmatprep.subr.mxu0 %v2191_v16 }
  0x8c   : > { %1567 = vmatpush3.msra.mxu0 %v2191_v16 }
  0x8d   : > { %1568 = vmatprep.subr.mxu0 %v2198_v17 }
  0x8e   : > { %1569 = vmatpush3.msra.mxu0 %v2198_v17 }
  0x8f   : > { %1570 = vmatprep.subr.mxu0 %v2205_v18 }
  0x90   : > { %1571 = vmatpush3.msra.mxu0 %v2205_v18 }
  0x91   : > { %1572 = vmatprep.subr.mxu0 %v2212_v19 }
  0x92   : > { %1573 = vmatpush3.msra.mxu0 %v2212_v19 }
  0x93   : > { %1574 = vmatprep.subr.mxu0 %v2219_v20 }
  0x94   : > { %1575 = vmatpush3.msra.mxu0 %v2219_v20 }
  0x95   : > { %1576 = vmatprep.subr.mxu0 %v2226_v21 }
  0x96   : > { %1577 = vmatpush3.msra.mxu0 %v2226_v21 }
  0x97   : > { %1578 = vmatprep.subr.mxu0 %v2233_v22 }
  0x98   : > { %1579 = vmatpush3.msra.mxu0 %v2233_v22 }
  0x99   : > { %1640 = vmatprep.subr.mxu0 %v2134_v5 }
 0x11f   : > { %v1501_v25 = vpop.f32.mrf.mxu1 }
 0x121   : > { %v496_v26 = vpop.f32.mrf.mxu1 }
 0x122   : > { %1534 = vmatprep.mubr.f32.mxu1 %v496_v26 }
 0x123   : > { %1535 = vmatmul.mubr.f32.vlgmr.msra.gmra.mxu1 %v1501_v25 }
 0x124   : > { %1538 = vmatpush3.msra.mxu1 %v607_v24  ;;  %1545 = vmatprep.mubr.msk.f32.mxu1 %vm423_vm1, %v2129_v3 }
 0x125   : > { %1539 = vmatprep.subr.mxu1 %v606_v27 }
 0x126   : > { %1540 = vmatpush3.msra.mxu1 %v606_v27 }
 0x127   : > { %1541 = vmatprep.subr.mxu1 %v605_v28 }
 0x128   : > { %1542 = vmatpush3.msra.mxu1 %v605_v28 }
 0x129   : > { %1543 = vmatprep.subr.mxu1 %v604_v29 }
 0x12a   : > { %1544 = vmatpush3.msra.mxu1 %v604_v29 }
 0x12b   : > { %1546 = vmatmul.mubr.msk.f32.vlgmr.msra.gmra.mxu1 %vm423_vm1, %v2146_v9  ;;  %1583 = vmatprep.subr.mxu1 %v786_v30 }
 0x12c   : > { %1584 = vmatpush3.msra.mxu1 %v786_v30  ;;  %1591 = vmatprep.mubr.msk.f32.mxu1 %vm423_vm1, %v2129_v3 }
 0x12d   : > { %1585 = vmatprep.subr.mxu1 %v785_v31 }
 0x12e   : > { %1586 = vmatpush3.msra.mxu1 %v785_v31 }
 0x12f   : > { %1587 = vmatprep.subr.mxu1 %v784_v32 }
 0x130   : > { %1588 = vmatpush3.msra.mxu1 %v784_v32 }
 0x131   : > { %1589 = vmatprep.subr.mxu1 %v783_v33 }
 0x132   : > { %1590 = vmatpush3.msra.mxu1 %v783_v33 }
 0x133   : > { %1592 = vmatmul.mubr.msk.f32.vlgmr.msra.gmra.mxu1 %vm423_vm1, %v2146_v9  ;;  %1594 = vmatprep.subr.mxu1 %v2134_v5 }
 0x134   : > { %1595 = vmatpush3.msra.mxu1 %v2134_v5 }
 0x135   : > { %1596 = vmatprep.subr.mxu1 %v2137_v6 }
 0x136   : > { %1597 = vmatpush3.msra.mxu1 %v2137_v6 }
 0x137   : > { %1598 = vmatprep.subr.mxu1 %v2142_v8 }
 0x138   : > { %1599 = vmatpush3.msra.mxu1 %v2142_v8  ;;  %v412_v34 = vpop.f32.mrf.mxu0 }
 0x139   : > { %416 = vst [vmem:[#allocation2] sm:$0xf] %v412_v34  ;;  %1600 = vmatprep.subr.mxu1 %v2150_v10 }
 0x13a   : > { %1601 = vmatpush3.msra.mxu1 %v2150_v10  ;;  %v1490_v35 = vpop.f32.mrf.mxu0 }
 0x13b   : > { %1602 = vmatprep.subr.mxu1 %v2155_v11 }
 0x13c   : > { %1603 = vmatpush3.msra.mxu1 %v2155_v11 }
 0x13d   : > { %1604 = vmatprep.subr.mxu1 %v2163_v12 }
 0x13e   : > { %1605 = vmatpush3.msra.mxu1 %v2163_v12 }
 0x13f   : > { %1606 = vmatprep.subr.mxu1 %v2170_v13 }
 0x140   : > { %1607 = vmatpush3.msra.mxu1 %v2170_v13  ;;  %v1319_v37 = vld [vmem:[#allocation2] ss:$0 sm:$0xff]  ;;  %v1322_v49 = vld [vmem:[#allocation2 + $0x1] ss:$0 sm:$0xff]  ;;  %v1327_v54 = vld [vmem:[#allocation2 + $0x2] ss:$0 sm:$0xff] }
 0x141   : > { %1608 = vmatprep.subr.mxu1 %v2177_v14  ;;  %v1332_v62 = vld [vmem:[#allocation2 + $0x3] ss:$0 sm:$0xff] }
 0x142   : > { %1609 = vmatpush3.msra.mxu1 %v2177_v14 }
 0x143   : > { %1610 = vmatprep.subr.mxu1 %v2184_v15 }
 0x144   : > { %1611 = vmatpush3.msra.mxu1 %v2184_v15 }
 0x145   : > { %1612 = vmatprep.subr.mxu1 %v2191_v16 }
 0x146   : > { %1613 = vmatpush3.msra.mxu1 %v2191_v16 }
 0x147   : > { %1614 = vmatprep.subr.mxu1 %v2198_v17 }
 0x148   : > { %1615 = vmatpush3.msra.mxu1 %v2198_v17 }
 0x149   : > { %1616 = vmatprep.subr.mxu1 %v2205_v18 }
 0x14a   : > { %1617 = vmatpush3.msra.mxu1 %v2205_v18 }
 0x14b   : > { %1618 = vmatprep.subr.mxu1 %v2212_v19 }
 0x14c   : > { %1619 = vmatpush3.msra.mxu1 %v2212_v19 }
 0x14d   : > { %1620 = vmatprep.subr.mxu1 %v2219_v20 }
 0x14e   : > { %1621 = vmatpush3.msra.mxu1 %v2219_v20 }
 0x14f   : > { %1622 = vmatprep.subr.mxu1 %v2226_v21 }
 0x150   : > { %1623 = vmatpush3.msra.mxu1 %v2226_v21 }
 0x151   : > { %1624 = vmatprep.subr.mxu1 %v2233_v22 }
 0x152   : > { %1625 = vmatpush3.msra.mxu1 %v2233_v22 }
 0x153   : > { %1629 = vmatprep.subr.mxu1 %v965_v36 }
 0x1e3   : > { %v1536_v38 = vpop.f32.mrf.mxu1 }
 0x1e4   : > { %v598_v39 = vadd.f32 %v1536_v38, %v1319_v37 }
 0x1e5   : > { %v592_v40 = vpop.f32.mrf.mxu1 }
 0x1e6   : > { %602 = vst [vmem:[%s2326_s30 + $0x8] sm:$0xff] %v598_v39  ;;  %v593_v41 = vadd.f32 %v1319_v37, %v592_v40 }
 0x1e8   : > { %601 = vst [vmem:[%s2326_s30] sm:$0xff] %v593_v41 }
 0x1eb   : > { %v1547_v42 = vpop.f32.mrf.mxu1 }
 0x1ed   : > { %v674_v43 = vpop.f32.mrf.mxu1 }
 0x1ee   : > { %1580 = vmatprep.mubr.f32.mxu0 %v674_v43 }
 0x1ef   : > { %1581 = vmatmul.mubr.f32.vlgmr.msra.gmra.mxu0 %v1547_v42 }
 0x1f0   : > { %1641 = vmatpush3.msra.mxu0 %v2134_v5 }
 0x1f1   : > { %1642 = vmatprep.subr.mxu0 %v2137_v6 }
 0x1f2   : > { %1643 = vmatpush3.msra.mxu0 %v2137_v6 }
 0x1f3   : > { %v1593_v44 = vpop.f32.mrf.mxu1  ;;  %1644 = vmatprep.subr.mxu0 %v2142_v8 }
 0x1f4   : > { %1645 = vmatpush3.msra.mxu0 %v2142_v8 }
 0x1f5   : > { %v853_v45 = vpop.f32.mrf.mxu1  ;;  %1646 = vmatprep.subr.mxu0 %v2150_v10 }
 0x1f6   : > { %1626 = vmatprep.mubr.f32.mxu1 %v853_v45  ;;  %1647 = vmatpush3.msra.mxu0 %v2150_v10 }
 0x1f7   : > { %1627 = vmatmul.mubr.f32.vlgmr.msra.gmra.mxu1 %v1593_v44  ;;  %1648 = vmatprep.subr.mxu0 %v2155_v11 }
 0x1f8   : > { %1630 = vmatpush3.msra.mxu1 %v965_v36  ;;  %1637 = vmatprep.mubr.msk.f32.mxu1 %vm423_vm1, %v2129_v3 }
 0x1f9   : > { %1631 = vmatprep.subr.mxu1 %v964_v46  ;;  %1649 = vmatpush3.msra.mxu0 %v2155_v11 }
 0x1fa   : > { %1632 = vmatpush3.msra.mxu1 %v964_v46  ;;  %1650 = vmatprep.subr.mxu0 %v2163_v12 }
 0x1fb   : > { %1633 = vmatprep.subr.mxu1 %v963_v47  ;;  %1651 = vmatpush3.msra.mxu0 %v2163_v12 }
 0x1fc   : > { %1634 = vmatpush3.msra.mxu1 %v963_v47  ;;  %1652 = vmatprep.subr.mxu0 %v2170_v13 }
 0x1fd   : > { %1635 = vmatprep.subr.mxu1 %v962_v48  ;;  %1653 = vmatpush3.msra.mxu0 %v2170_v13 }
 0x1fe   : > { %1636 = vmatpush3.msra.mxu1 %v962_v48  ;;  %1654 = vmatprep.subr.mxu0 %v2177_v14 }
 0x1ff   : > { %1638 = vmatmul.mubr.msk.f32.vlgmr.msra.gmra.mxu1 %vm423_vm1, %v2146_v9  ;;  %1655 = vmatpush3.msra.mxu0 %v2177_v14 }
 0x200   : > { %1656 = vmatprep.subr.mxu0 %v2184_v15 }
 0x201   : > { %1657 = vmatpush3.msra.mxu0 %v2184_v15 }
 0x202   : > { %1658 = vmatprep.subr.mxu0 %v2191_v16 }
 0x203   : > { %1659 = vmatpush3.msra.mxu0 %v2191_v16 }
 0x204   : > { %1660 = vmatprep.subr.mxu0 %v2198_v17 }
 0x205   : > { %1661 = vmatpush3.msra.mxu0 %v2198_v17 }
 0x206   : > { %1662 = vmatprep.subr.mxu0 %v2205_v18 }
 0x207   : > { %1663 = vmatpush3.msra.mxu0 %v2205_v18 }
 0x208   : > { %1664 = vmatprep.subr.mxu0 %v2212_v19 }
 0x209   : > { %1665 = vmatpush3.msra.mxu0 %v2212_v19 }
 0x20a   : > { %1666 = vmatprep.subr.mxu0 %v2219_v20 }
 0x20b   : > { %1667 = vmatpush3.msra.mxu0 %v2219_v20 }
 0x20c   : > { %1668 = vmatprep.subr.mxu0 %v2226_v21 }
 0x20d   : > { %1669 = vmatpush3.msra.mxu0 %v2226_v21 }
 0x20e   : > { %1670 = vmatprep.subr.mxu0 %v2233_v22 }
 0x20f   : > { %1671 = vmatpush3.msra.mxu0 %v2233_v22 }
 0x2af   : > { %v1582_v50 = vpop.f32.mrf.mxu0 }
 0x2b0   : > { %v776_v51 = vadd.f32 %v1582_v50, %v1322_v49 }
 0x2b1   : > { %v770_v52 = vpop.f32.mrf.mxu0 }
 0x2b2   : > { %1324 = vst [vmem:[%s2326_s30 + $0x18] sm:$0xff] %v776_v51  ;;  %v771_v53 = vadd.f32 %v1322_v49, %v770_v52 }
 0x2b4   : > { %1323 = vst [vmem:[%s2326_s30 + $0x10] sm:$0xff] %v771_v53 }
 0x2b7   : > { %v1628_v55 = vpop.f32.mrf.mxu1 }
 0x2b8   : > { %v955_v56 = vadd.f32 %v1628_v55, %v1327_v54 }
 0x2b9   : > { %v949_v57 = vpop.f32.mrf.mxu1 }
 0x2ba   : > { %1329 = vst [vmem:[%s2326_s30 + $0x28] sm:$0xff] %v955_v56  ;;  %v950_v58 = vadd.f32 %v1327_v54, %v949_v57 }
 0x2bc   : > { %1328 = vst [vmem:[%s2326_s30 + $0x20] sm:$0xff] %v950_v58 }
 0x2bf   : > { %v1639_v59 = vpop.f32.mrf.mxu1 }
 0x2c1   : > { %v1032_v60 = vpop.f32.mrf.mxu1 }
 0x2c2   : > { %1672 = vmatprep.mubr.f32.mxu0 %v1032_v60 }
 0x2c3   : > { %1673 = vmatmul.mubr.f32.vlgmr.msra.gmra.mxu0 %v1639_v59 }
 0x383   : > { %v1674_v61 = vpop.f32.mrf.mxu0 }
 0x384   : > { %v1134_v63 = vadd.f32 %v1674_v61, %v1332_v62 }
 0x385   : > { %v1128_v0 = vpop.f32.mrf.mxu0 }
 0x386   : > { %1334 = vst [vmem:[%s2326_s30 + $0x38] sm:$0xff] %v1134_v63  ;;  %v1129_v1 = vadd.f32 %v1332_v62, %v1128_v0 }
 0x388   : > { %1333 = vst [vmem:[%s2326_s30 + $0x30] sm:$0xff] %v1129_v1 }
 0x389   : > { %1854 = shalt.err (!%p1851_p6)
}
 0x38a   : > { %s1855_s10 = scalar_lea.hbm %s2376_s28, 1024  ;;  %s1859_s20 = scalar_lea.hbm %s2430_s4, 2048 }
 0x38b   : > { %p1856_p9 = scmp.ne.s32.totalorder %s2376_s28, %s1855_s10  ;;  %p1860_p11 = scmp.lt.s32.totalorder %s2376_s28, %s2430_s4 }
 0x38c   : > { %p1861_p3 = scmp.lt.s32.totalorder %s1859_s20, %s1855_s10 }
 0x38d   : > { %p1857_p12 = pnand %p1856_p9, %p2052_p0 }
 0x38e   : > { %p1862_p1 = por %p1861_p3, %p1860_p11 }
 0x38f   : > { %p1858_p13 = pneg %p1857_p12 }
 0x391   : > { %p1863_p4 = pnand %p1862_p1, %p1858_p13 }
 0x393   : > { %1866 = shalt.err (!%p1863_p4)
}
 0x394   : > { %s1939_s5 = smov 128   ;;  %s1940_s6 = smov 8  }
 0x395   : > { %1683 = dma.vmem_to_hbm [thread:$0]  (%p2052_p0), %s2371_s8, 1024, %s2376_s28, %s1141_s7, %s1939_s5, %s1939_s5, %s1940_s6  }
 0x396 PF: > { %s2457_s21 = sld [smem:[#allocation15_spill]]  ;;  %s1174_s23 = sand.u32 1, %s1909_s15  }
 0x397   : > { %p2458_p8 = scmp.ne.s32.totalorder %s2444_s24, 0  ;;  %s1175_s22 = scalar_lea.sflag [#allocation5], %s1174_s23 }
 0x399   : > { %p1697_p5 = pnand %p1305_p10, %p2458_p8 }
 0x39b   : > { %p1698_p7 = pneg %p1697_p5 }
 0x39d   : > { %1904 = dma.done.wait (%p1698_p7), %s1175_s22, 1024  }
 0x39e   : > { %1906 = vsyncadd (%p1698_p7), %s1175_s22, 4294966272  ;;  %s23_s20 = sadd.s32 1, %s2457_s21   ;;  %s2459_s30 = sld [smem:[#allocation14_spill]] }
 0x39f   : > { %p20_p2 = scmp.ge.s32.totalorder %s23_s20, 4   ;;  %s2460_s17 = sld [smem:[#allocation17_spill]] }
 0x3a0   : > { %s2461_s11 = sld [smem:[#allocation16_spill]]  ;;  %s2462_s15 = smov %s1913_s16 }
 0x3a1   : > { %s2464_s18 = smov %s1925_s19 }
 0x3a2   :  { %22 = sbr.rel (!%p20_p2) target bundleno = 11 (0xb), region = 112 }
 0x3a4   : > { %s2463_s16 = smov %s2459_s30 }
 0x3a6   : > { %s2465_s19 = smov %s2461_s11 }
 0x3a7   :  { %1180 = vsyncpa [#allocation4], 1 }
 0x3a8   :  { %1182 = vsyncpa [#allocation4 + $0x1], 1 }
 0x3a9   :  { %1183 = vsyncpa [#allocation7], 1 }
 0x3aa   :  { %1185 = vsyncpa [#allocation7 + $0x1], 1 }
 0x3ab   :  { %1186 = vsyncpa [#allocation5], 1 }
 0x3ac   :  { %1188 = vsyncpa [#allocation5 + $0x1], 1 }

</bundles_post_ra>
